<compile_context>
chip_gen: v7x
topology: tpu7x:2x2x1
jax: 0.10.0
libtpu: 0.0.40
codegen_flags: <defaults>
</compile_context>

<pallas_src>
import functools
import math

import jax
import jax.numpy as jnp
from jax.experimental import pallas as pl
from jax.experimental.pallas import tpu as pltpu


def mha_kernel(
    q_ref,        # (1, TQ, Fp)    raw query tile
    k_ref,        # (1, H, TKV, dqp) pre-projected K tile
    v_ref,        # (1, H, TKV, dqp) pre-projected V tile
    wq_ref,       # (Fp, H*dqp)    scale-folded, head-padded Q weights
    bq_ref,       # (1, H*dqp)
    wo_ref,       # (H*dqp, Fp)
    bo_ref,       # (1, Fp)
    o_ref,        # (1, TQ, Fp)
    q3_sc,        # (H, TQ, dqp)   projected Q, persists across kv steps
    m_sc,         # (H, TQ, 1)     running max   (f32)
    l_sc,         # (H, TQ, 1)     running sum   (f32)
    acc_sc,       # (H, TQ, dqp)   running PV    (f32)
):
    kv = pl.program_id(2)
    nkv = pl.num_programs(2)

    @pl.when(kv == 0)
    def _init():
        # Project this query tile ONCE (reused across all KV steps).
        xq = q_ref[0]                                                # (TQ, Fp)
        q_all = (jnp.dot(xq, wq_ref[...], preferred_element_type=jnp.float32)
                 + bq_ref[...])                                      # (TQ, H*dqp), scale folded in
        tq = q_all.shape[0]
        h, _, dqp = q3_sc.shape
        q3_sc[...] = jnp.transpose(q_all.reshape(tq, h, dqp), (1, 0, 2)).astype(q3_sc.dtype)
        m_sc[...] = jnp.full_like(m_sc, -jnp.inf)
        l_sc[...] = jnp.zeros_like(l_sc)
        acc_sc[...] = jnp.zeros_like(acc_sc)

    k3 = k_ref[0]                                                    # (H, TKV, dqp)
    v3 = v_ref[0]

    # Batched QK^T over heads; dqp is MXU-native (multiple of 128).
    s = jnp.einsum("hqd,hkd->hqk", q3_sc[...], k3,
                   preferred_element_type=jnp.float32)               # (H, TQ, TKV)

    # Online (flash) softmax update; statistics stay in f32.
    m_prev = m_sc[...]
    m_new = jnp.maximum(m_prev, jnp.max(s, axis=-1, keepdims=True))
    alpha = jnp.exp(m_prev - m_new)
    p = jnp.exp(s - m_new)
    l_sc[...] = alpha * l_sc[...] + jnp.sum(p, axis=-1, keepdims=True)
    acc_sc[...] = alpha * acc_sc[...] + jnp.einsum(
        "hqk,hkd->hqd", p.astype(v3.dtype), v3,
        preferred_element_type=jnp.float32)                          # (H, TQ, dqp)
    m_sc[...] = m_new

    @pl.when(kv == nkv - 1)
    def _finalize():
        inv_l = pl.reciprocal(l_sc[...], approx=False)               # exact normalization
        ctx = (acc_sc[...] * inv_l).astype(wo_ref.dtype)             # (H, TQ, dqp)
        # Single relayout per query tile (amortized over all KV steps), then one
        # wide K = H*dqp output-projection GEMM and one lane-dense store.
        attn = jnp.transpose(ctx, (1, 0, 2)).reshape(ctx.shape[1], ctx.shape[0] * ctx.shape[2])
        out = (jnp.dot(attn, wo_ref[...], preferred_element_type=jnp.float32)
               + bo_ref[...])
        o_ref[0] = out.astype(o_ref.dtype)


def _round_up(x, m):
    return ((x + m - 1) // m) * m


def _divisor_tile(s, cap):
    """Largest multiple of 8 that divides s and is <= cap; else the full extent."""
    cap = min(cap, s)
    t = cap - (cap % 8)
    while t >= 8:
        if s % t == 0:
            return t
        t -= 8
    return s


def _vmem_budget_bytes():
    """Generation-aware VMEM budget (v5e/v6e: 128 MiB, v7x: 64 MiB per TC)."""
    cap = None
    try:
        cap = int(pltpu.get_tpu_info().vmem_capacity_bytes)
    except Exception:
        cap = None
    if not cap or cap <= 0:
        cap = 64 * 1024 * 1024   # conservative fallback = v7x per-TC physical VMEM
    return int(cap * 0.85)       # headroom for compiler-internal scratch


def _pick_tiles(S, H, dqp, Fp, itemsize, budget):
    """Budget-driven TQ/TKV choice; shrinks tiles until the live set fits."""
    tq_cap, tkv_cap = 512, 512
    while True:
        tq = _divisor_tile(S, tq_cap)
        tkv = _divisor_tile(S, tkv_cap)
        est = (
            H * tq * dqp * (4 + itemsize)              # acc (f32) + q3 scratch
            + 2 * H * tq * 4                           # m, l
            + 3 * H * tq * tkv * 4                     # scores / p / temporaries
            + 2 * 2 * H * tkv * dqp * itemsize         # K, V blocks (double-buffered)
            + 2 * 2 * tq * Fp * itemsize               # q-in + out blocks (double-buffered)
            + 2 * (2 * Fp * H * dqp + Fp) * itemsize   # wq + wo (+bo), double-buffered
        )
        if est <= budget or (tq_cap <= 128 and tkv_cap <= 128):
            return tq, tkv
        if tkv_cap > 128:
            tkv_cap //= 2
        else:
            tq_cap //= 2


def multi_head_attention(query, key, value, params, *, num_heads, dim_qkv,
                         compute_dtype=None):
    """query/key/value: (B, S, F). Returns (B, S, F)."""
    B, S, F = query.shape
    H, dq = num_heads, dim_qkv
    dqp = _round_up(dq, 128)        # MXU-native head dim for the attention matmuls
    Fp = _round_up(F, 128)          # lane-dense query loads / output store
    HDp = H * dqp
    mm = compute_dtype if compute_dtype is not None else jnp.float32
    itemsize = jnp.dtype(mm).itemsize

    # PyTorch scales by sqrt(Q.size(-1)) == sqrt(dim_qkv).
    scale = 1.0 / math.sqrt(float(dq))

    def pad_head_cols(a):           # (..., H*dq) -> (..., H*dqp), zero-pad each head slice
        lead = a.shape[:-1]
        a = a.reshape(*lead, H, dq)
        a = jnp.pad(a, [(0, 0)] * len(lead) + [(0, 0), (0, dqp - dq)])
        return a.reshape(*lead, HDp)

    # ---- weight prep (all padding is exact: padded rows/cols are zero) ----
    # Fold the softmax scale into the Q projection (zero in-kernel cost).
    wq = pad_head_cols(params["wq"] * scale)                     # (F,  HDp)
    bq = pad_head_cols(params["bq"] * scale)                     # (1,  HDp)
    wq = jnp.pad(wq, [(0, Fp - F), (0, 0)])                      # (Fp, HDp)
    wk = pad_head_cols(params["wk"])                             # (F,  HDp)
    bk = pad_head_cols(params["bk"])
    wv = pad_head_cols(params["wv"])
    bv = pad_head_cols(params["bv"])
    wo = params["wo"].reshape(H, dq, F)
    wo = jnp.pad(wo, [(0, 0), (0, dqp - dq), (0, Fp - F)]).reshape(HDp, Fp)
    bo = jnp.pad(params["bo"], [(0, 0), (0, Fp - F)])            # (1, Fp)

    # ---- K/V projection pre-pass: one big XLA GEMM per tensor (done once),
    #      laid out head-major so the kernel never transposes K/V. ----
    k3 = (jnp.einsum("bsf,fn->bsn", key, wk) + bk).reshape(B, S, H, dqp)
    v3 = (jnp.einsum("bsf,fn->bsn", value, wv) + bv).reshape(B, S, H, dqp)
    k3 = jnp.transpose(k3, (0, 2, 1, 3)).astype(mm)              # (B, H, S, dqp)
    v3 = jnp.transpose(v3, (0, 2, 1, 3)).astype(mm)

    xq = jnp.pad(query, [(0, 0), (0, 0), (0, Fp - F)]).astype(mm)
    wq = wq.astype(mm)
    wo = wo.astype(mm)
    bq = bq.astype(jnp.float32)
    bo = bo.astype(jnp.float32)

    budget = _vmem_budget_bytes()
    TQ, TKV = _pick_tiles(S, H, dqp, Fp, itemsize, budget)
    nq, nkv = S // TQ, S // TKV

    in_specs = [
        pl.BlockSpec((1, TQ, Fp), lambda b, qi, kv: (b, qi, 0)),          # query tile
        pl.BlockSpec((1, H, TKV, dqp), lambda b, qi, kv: (b, 0, kv, 0)),  # K tile
        pl.BlockSpec((1, H, TKV, dqp), lambda b, qi, kv: (b, 0, kv, 0)),  # V tile
        # Constant weight blocks (index map ignores the grid).  They are still
        # double-buffered by the pipeliner; pl.Buffered(1) would halve that but
        # is intentionally omitted for compatibility.
        pl.BlockSpec(wq.shape, lambda b, qi, kv: (0, 0)),
        pl.BlockSpec(bq.shape, lambda b, qi, kv: (0, 0)),
        pl.BlockSpec(wo.shape, lambda b, qi, kv: (0, 0)),
        pl.BlockSpec(bo.shape, lambda b, qi, kv: (0, 0)),
    ]
    out_spec = pl.BlockSpec((1, TQ, Fp), lambda b, qi, kv: (b, qi, 0))

    scratch_shapes = [
        pltpu.VMEM((H, TQ, dqp), mm),            # projected (scaled) Q, carried over kv
        pltpu.VMEM((H, TQ, 1), jnp.float32),     # running max
        pltpu.VMEM((H, TQ, 1), jnp.float32),     # running sum
        pltpu.VMEM((H, TQ, dqp), jnp.float32),   # running PV accumulator
    ]

    # Advisory cost estimate reflecting what actually runs inside the kernel
    # (K/V projection happens in the pre-pass, not here).
    flops = (2 * B * S * Fp * HDp            # Q projection
             + 4 * B * H * S * S * dqp       # QK^T + PV
             + 2 * B * S * HDp * Fp)         # output projection
    transcendentals = B * H * S * (S + nkv + 1)
    bytes_accessed = int(
        B * S * Fp * itemsize                        # query read
        + 2 * nq * B * H * S * dqp * itemsize        # K/V re-read once per query tile
        + 2 * Fp * HDp * itemsize + (HDp + Fp) * 4   # weights + biases
        + B * S * Fp * query.dtype.itemsize)         # output write

    out = pl.pallas_call(
        mha_kernel,
        out_shape=jax.ShapeDtypeStruct((B, S, Fp), query.dtype),
        grid_spec=pltpu.PrefetchScalarGridSpec(
            num_scalar_prefetch=0,
            grid=(B, nq, nkv),                       # kv (reduction/carry) axis last
            in_specs=in_specs,
            out_specs=out_spec,
            scratch_shapes=scratch_shapes,
        ),
        compiler_params=pltpu.CompilerParams(
            dimension_semantics=("parallel", "parallel", "arbitrary"),
            vmem_limit_bytes=budget,
        ),
        cost_estimate=pl.CostEstimate(
            flops=int(flops),
            transcendentals=int(transcendentals),
            bytes_accessed=int(bytes_accessed),
        ),
    )(xq, k3, v3, wq, bq, wo, bo)

    return out[..., :F] if Fp != F else out


def init_params(key, dim_features, dim_heads):
    """Per-head q/k/v Linears fused along the output dim (matches the PyTorch module)."""
    dim_qkv = max(1, dim_features // dim_heads)
    hd = dim_heads * dim_qkv
    ks = jax.random.split(key, 4)

    def lin(k, fan_in, fan_out):
        bound = 1.0 / math.sqrt(fan_in)
        kw, kb = jax.random.split(k)
        w = jax.random.uniform(kw, (fan_in, fan_out), jnp.float32, -bound, bound)
        b = jax.random.uniform(kb, (1, fan_out), jnp.float32, -bound, bound)
        return w, b

    wq, bq = lin(ks[0], dim_features, hd)
    wk, bk = lin(ks[1], dim_features, hd)
    wv, bv = lin(ks[2], dim_features, hd)
    wo, bo = lin(ks[3], hd, dim_features)
    params = dict(wq=wq, bq=bq, wk=wk, bk=bk, wv=wv, bv=bv, wo=wo, bo=bo)
    return params, dim_qkv


def reference_mha(xq, xk, xv, params, num_heads, dim_qkv):
    """Pure-JAX reference mirroring the PyTorch module exactly (per-head loop)."""
    q = xq @ params["wq"] + params["bq"]
    k = xk @ params["wk"] + params["bk"]
    v = xv @ params["wv"] + params["bv"]
    outs = []
    for h in range(num_heads):
        sl = slice(h * dim_qkv, (h + 1) * dim_qkv)
        sc = jnp.einsum("bsd,btd->bst", q[..., sl], k[..., sl]) / math.sqrt(dim_qkv)
        p = jax.nn.softmax(sc, axis=-1)
        outs.append(jnp.einsum("bst,btd->bsd", p, v[..., sl]))
    return jnp.concatenate(outs, axis=-1) @ params["wo"] + params["bo"]


if __name__ == "__main__":
    B, S, F, H = 2, 8, 32, 4

    root = jax.random.PRNGKey(0)
    kq, kk, kv, kp = jax.random.split(root, 4)
    query = jax.random.normal(kq, (B, S, F), jnp.float32)
    key_in = jax.random.normal(kk, (B, S, F), jnp.float32)
    value = jax.random.normal(kv, (B, S, F), jnp.float32)
    params, dim_qkv = init_params(kp, F, H)

    out = multi_head_attention(query, key_in, value, params,
                               num_heads=H, dim_qkv=dim_qkv)
    out = jax.block_until_ready(out)

    ref = reference_mha(query, key_in, value, params, H, dim_qkv)
    assert out.shape == (B, S, F)
    # Exact softmax normalization now (pl.reciprocal(approx=False)), f32 accumulation.
    assert jnp.allclose(out, ref, atol=5e-4, rtol=5e-4), "mismatch vs reference"

    print("KERNEL_OK")
</pallas_src>

<mosaic_0001>
module attributes {stable_mosaic.version = 11 : i64} {
  func.func @mha_kernel(%arg0: i32, %arg1: i32, %arg2: i32, %arg3: memref<1x8x128xf32, #tpu.memory_space<vmem>>, %arg4: memref<1x4x8x128xf32, #tpu.memory_space<vmem>>, %arg5: memref<1x4x8x128xf32, #tpu.memory_space<vmem>>, %arg6: memref<128x512xf32, #tpu.memory_space<vmem>>, %arg7: memref<1x512xf32, #tpu.memory_space<vmem>>, %arg8: memref<512x128xf32, #tpu.memory_space<vmem>>, %arg9: memref<1x128xf32, #tpu.memory_space<vmem>>, %arg10: memref<1x8x128xf32, #tpu.memory_space<vmem>>, %arg11: memref<4x8x128xf32, #tpu.memory_space<vmem>>, %arg12: memref<4x8x1xf32, #tpu.memory_space<vmem>>, %arg13: memref<4x8x1xf32, #tpu.memory_space<vmem>>, %arg14: memref<4x8x128xf32, #tpu.memory_space<vmem>>) attributes {dimension_semantics = [#tpu.dimension_semantics<parallel>, #tpu.dimension_semantics<parallel>, #tpu.dimension_semantics<arbitrary>], iteration_bounds = array<i64: 2, 1, 1>, scalar_prefetch = 0 : i64, scratch_operands = 4 : i64, tpu.core_type = #tpu.core_type<tc>, window_params = [{transform_indices = @transform_0, window_bounds = array<i64: 1, 8, 128>}, {transform_indices = @transform_1, window_bounds = array<i64: 1, 4, 8, 128>}, {transform_indices = @transform_2, window_bounds = array<i64: 1, 4, 8, 128>}, {pipeline_mode = #tpu.pipeline_mode<synchronous>, transform_indices = @transform_3, window_bounds = array<i64: 128, 512>}, {pipeline_mode = #tpu.pipeline_mode<synchronous>, transform_indices = @transform_4, window_bounds = array<i64: 1, 512>}, {pipeline_mode = #tpu.pipeline_mode<synchronous>, transform_indices = @transform_5, window_bounds = array<i64: 512, 128>}, {pipeline_mode = #tpu.pipeline_mode<synchronous>, transform_indices = @transform_6, window_bounds = array<i64: 1, 128>}, {transform_indices = @transform_7, window_bounds = array<i64: 1, 8, 128>}]} {
    %c0_i32 = arith.constant 0 : i32
    %0 = arith.cmpi eq, %arg2, %c0_i32 : i32
    %1 = arith.extui %0 : i1 to i32
    %c0_i32_0 = arith.constant 0 : i32
    %2 = arith.cmpi ne, %1, %c0_i32_0 : i32
    scf.if %2 {
      %c0_34 = arith.constant 0 : index
      %c0_35 = arith.constant 0 : index
      %c0_36 = arith.constant 0 : index
      %34 = vector.load %arg3[%c0_34, %c0_35, %c0_36] : memref<1x8x128xf32, #tpu.memory_space<vmem>>, vector<1x8x128xf32>
      %35 = vector.shape_cast %34 : vector<1x8x128xf32> to vector<8x128xf32>
      %c0_37 = arith.constant 0 : index
      %c0_38 = arith.constant 0 : index
      %36 = vector.load %arg6[%c0_37, %c0_38] : memref<128x512xf32, #tpu.memory_space<vmem>>, vector<128x512xf32>
      %cst_39 = arith.constant dense<0.000000e+00> : vector<8x512xf32>
      %37 = tpu.matmul %35, %36, %cst_39 {dimension_numbers = #tpu.dot_dimension_numbers<[1], [0], [0], [1], [0, 0, 1, 1], [], []>} : vector<8x128xf32>, vector<128x512xf32>, vector<8x512xf32> -> vector<8x512xf32>
      %c0_40 = arith.constant 0 : index
      %c0_41 = arith.constant 0 : index
      %38 = vector.load %arg7[%c0_40, %c0_41] : memref<1x512xf32, #tpu.memory_space<vmem>>, vector<1x512xf32>
      %39 = vector.broadcast %38 : vector<1x512xf32> to vector<8x512xf32>
      %40 = arith.addf %37, %39 : vector<8x512xf32>
      %41 = vector.shape_cast %40 : vector<8x512xf32> to vector<8x4x128xf32>
      %42 = tpu.transpose %41, [1, 0, 2] : vector<8x4x128xf32> -> vector<4x8x128xf32>
      %c0_42 = arith.constant 0 : index
      %c0_43 = arith.constant 0 : index
      %c0_44 = arith.constant 0 : index
      %43 = vector.load %arg11[%c0_42, %c0_43, %c0_44] : memref<4x8x128xf32, #tpu.memory_space<vmem>>, vector<4x8x128xf32>
      tpu.vector_store %arg11[%c0_42, %c0_43, %c0_44], %42 {strides = array<i32>} : memref<4x8x128xf32, #tpu.memory_space<vmem>>, vector<4x8x128xf32>,
      %cst_45 = arith.constant 0xFF800000 : f32
      %44 = vector.broadcast %cst_45 : f32 to vector<4x8x1xf32>
      %c0_46 = arith.constant 0 : index
      %c0_47 = arith.constant 0 : index
      %c0_48 = arith.constant 0 : index
      %45 = vector.load %arg12[%c0_46, %c0_47, %c0_48] : memref<4x8x1xf32, #tpu.memory_space<vmem>>, vector<4x8x1xf32>
      tpu.vector_store %arg12[%c0_46, %c0_47, %c0_48], %44 {strides = array<i32>} : memref<4x8x1xf32, #tpu.memory_space<vmem>>, vector<4x8x1xf32>,
      %cst_49 = arith.constant 0.000000e+00 : f32
      %46 = vector.broadcast %cst_49 : f32 to vector<4x8x1xf32>
      %c0_50 = arith.constant 0 : index
      %c0_51 = arith.constant 0 : index
      %c0_52 = arith.constant 0 : index
      %47 = vector.load %arg13[%c0_50, %c0_51, %c0_52] : memref<4x8x1xf32, #tpu.memory_space<vmem>>, vector<4x8x1xf32>
      tpu.vector_store %arg13[%c0_50, %c0_51, %c0_52], %46 {strides = array<i32>} : memref<4x8x1xf32, #tpu.memory_space<vmem>>, vector<4x8x1xf32>,
      %cst_53 = arith.constant 0.000000e+00 : f32
      %48 = vector.broadcast %cst_53 : f32 to vector<4x8x128xf32>
      %c0_54 = arith.constant 0 : index
      %c0_55 = arith.constant 0 : index
      %c0_56 = arith.constant 0 : index
      %49 = vector.load %arg14[%c0_54, %c0_55, %c0_56] : memref<4x8x128xf32, #tpu.memory_space<vmem>>, vector<4x8x128xf32>
      tpu.vector_store %arg14[%c0_54, %c0_55, %c0_56], %48 {strides = array<i32>} : memref<4x8x128xf32, #tpu.memory_space<vmem>>, vector<4x8x128xf32>,
    } else {
    }
    %c0 = arith.constant 0 : index
    %c0_1 = arith.constant 0 : index
    %c0_2 = arith.constant 0 : index
    %c0_3 = arith.constant 0 : index
    %3 = vector.load %arg4[%c0, %c0_1, %c0_2, %c0_3] : memref<1x4x8x128xf32, #tpu.memory_space<vmem>>, vector<1x4x8x128xf32>
    %4 = vector.shape_cast %3 : vector<1x4x8x128xf32> to vector<4x8x128xf32>
    %c0_4 = arith.constant 0 : index
    %c0_5 = arith.constant 0 : index
    %c0_6 = arith.constant 0 : index
    %c0_7 = arith.constant 0 : index
    %5 = vector.load %arg5[%c0_4, %c0_5, %c0_6, %c0_7] : memref<1x4x8x128xf32, #tpu.memory_space<vmem>>, vector<1x4x8x128xf32>
    %6 = vector.shape_cast %5 : vector<1x4x8x128xf32> to vector<4x8x128xf32>
    %c0_8 = arith.constant 0 : index
    %c0_9 = arith.constant 0 : index
    %c0_10 = arith.constant 0 : index
    %7 = vector.load %arg11[%c0_8, %c0_9, %c0_10] : memref<4x8x128xf32, #tpu.memory_space<vmem>>, vector<4x8x128xf32>
    "tpu.trace_start"() <{level = 10 : i32, message = "hqd,hkd->hqk"}> : () -> ()
    %cst = arith.constant dense<0.000000e+00> : vector<4x8x8xf32>
    %8 = tpu.matmul %7, %4, %cst {dimension_numbers = #tpu.dot_dimension_numbers<[2], [2], [1], [1], [0, 0, 0, 1, 1, 1], [0], [0]>} : vector<4x8x128xf32>, vector<4x8x128xf32>, vector<4x8x8xf32> -> vector<4x8x8xf32>
    "tpu.trace_stop"() : () -> ()
    %c0_11 = arith.constant 0 : index
    %c0_12 = arith.constant 0 : index
    %c0_13 = arith.constant 0 : index
    %9 = vector.load %arg12[%c0_11, %c0_12, %c0_13] : memref<4x8x1xf32, #tpu.memory_space<vmem>>, vector<4x8x1xf32>
    %cst_14 = arith.constant dense<0xFF800000> : vector<4x8xf32>
    %10 = vector.multi_reduction <maximumf>, %8, %cst_14 [2] : vector<4x8x8xf32> to vector<4x8xf32>
    %11 = vector.shape_cast %10 : vector<4x8xf32> to vector<4x8x1xf32>
    %12 = arith.maximumf %9, %11 : vector<4x8x1xf32>
    %13 = arith.subf %9, %12 : vector<4x8x1xf32>
    %14 = math.exp %13 : vector<4x8x1xf32>
    %15 = vector.broadcast %12 : vector<4x8x1xf32> to vector<4x8x8xf32>
    %16 = arith.subf %8, %15 : vector<4x8x8xf32>
    %17 = math.exp %16 : vector<4x8x8xf32>
    %c0_15 = arith.constant 0 : index
    %c0_16 = arith.constant 0 : index
    %c0_17 = arith.constant 0 : index
    %18 = vector.load %arg13[%c0_15, %c0_16, %c0_17] : memref<4x8x1xf32, #tpu.memory_space<vmem>>, vector<4x8x1xf32>
    %19 = arith.mulf %14, %18 : vector<4x8x1xf32>
    %cst_18 = arith.constant dense<0.000000e+00> : vector<4x8xf32>
    %20 = vector.multi_reduction <add>, %17, %cst_18 [2] : vector<4x8x8xf32> to vector<4x8xf32>
    %21 = vector.shape_cast %20 : vector<4x8xf32> to vector<4x8x1xf32>
    %22 = arith.addf %19, %21 : vector<4x8x1xf32>
    %c0_19 = arith.constant 0 : index
    %c0_20 = arith.constant 0 : index
    %c0_21 = arith.constant 0 : index
    %23 = vector.load %arg13[%c0_19, %c0_20, %c0_21] : memref<4x8x1xf32, #tpu.memory_space<vmem>>, vector<4x8x1xf32>
    tpu.vector_store %arg13[%c0_19, %c0_20, %c0_21], %22 {strides = array<i32>} : memref<4x8x1xf32, #tpu.memory_space<vmem>>, vector<4x8x1xf32>,
    %c0_22 = arith.constant 0 : index
    %c0_23 = arith.constant 0 : index
    %c0_24 = arith.constant 0 : index
    %24 = vector.load %arg14[%c0_22, %c0_23, %c0_24] : memref<4x8x128xf32, #tpu.memory_space<vmem>>, vector<4x8x128xf32>
    %25 = vector.broadcast %14 : vector<4x8x1xf32> to vector<4x8x128xf32>
    %26 = arith.mulf %25, %24 : vector<4x8x128xf32>
    "tpu.trace_start"() <{level = 10 : i32, message = "hqk,hkd->hqd"}> : () -> ()
    %cst_25 = arith.constant dense<0.000000e+00> : vector<4x8x128xf32>
    %27 = tpu.matmul %17, %6, %cst_25 {dimension_numbers = #tpu.dot_dimension_numbers<[2], [1], [1], [2], [0, 0, 0, 1, 1, 2], [0], [0]>} : vector<4x8x8xf32>, vector<4x8x128xf32>, vector<4x8x128xf32> -> vector<4x8x128xf32>
    "tpu.trace_stop"() : () -> ()
    %28 = arith.addf %26, %27 : vector<4x8x128xf32>
    %c0_26 = arith.constant 0 : index
    %c0_27 = arith.constant 0 : index
    %c0_28 = arith.constant 0 : index
    %29 = vector.load %arg14[%c0_26, %c0_27, %c0_28] : memref<4x8x128xf32, #tpu.memory_space<vmem>>, vector<4x8x128xf32>
    tpu.vector_store %arg14[%c0_26, %c0_27, %c0_28], %28 {strides = array<i32>} : memref<4x8x128xf32, #tpu.memory_space<vmem>>, vector<4x8x128xf32>,
    %c0_29 = arith.constant 0 : index
    %c0_30 = arith.constant 0 : index
    %c0_31 = arith.constant 0 : index
    %30 = vector.load %arg12[%c0_29, %c0_30, %c0_31] : memref<4x8x1xf32, #tpu.memory_space<vmem>>, vector<4x8x1xf32>
    tpu.vector_store %arg12[%c0_29, %c0_30, %c0_31], %12 {strides = array<i32>} : memref<4x8x1xf32, #tpu.memory_space<vmem>>, vector<4x8x1xf32>,
    %c0_i32_32 = arith.constant 0 : i32
    %31 = arith.cmpi eq, %arg2, %c0_i32_32 : i32
    %32 = arith.extui %31 : i1 to i32
    %c0_i32_33 = arith.constant 0 : i32
    %33 = arith.cmpi ne, %32, %c0_i32_33 : i32
    scf.if %33 {
      %c0_34 = arith.constant 0 : index
      %c0_35 = arith.constant 0 : index
      %c0_36 = arith.constant 0 : index
      %34 = vector.load %arg13[%c0_34, %c0_35, %c0_36] : memref<4x8x1xf32, #tpu.memory_space<vmem>>, vector<4x8x1xf32>
      %35 = tpu.reciprocal %34 : vector<4x8x1xf32> -> vector<4x8x1xf32>
      %c0_37 = arith.constant 0 : index
      %c0_38 = arith.constant 0 : index
      %c0_39 = arith.constant 0 : index
      %36 = vector.load %arg14[%c0_37, %c0_38, %c0_39] : memref<4x8x128xf32, #tpu.memory_space<vmem>>, vector<4x8x128xf32>
      %37 = vector.broadcast %35 : vector<4x8x1xf32> to vector<4x8x128xf32>
      %38 = arith.mulf %36, %37 : vector<4x8x128xf32>
      %39 = tpu.transpose %38, [1, 0, 2] : vector<4x8x128xf32> -> vector<8x4x128xf32>
      %40 = vector.shape_cast %39 : vector<8x4x128xf32> to vector<8x512xf32>
      %c0_40 = arith.constant 0 : index
      %c0_41 = arith.constant 0 : index
      %41 = vector.load %arg8[%c0_40, %c0_41] : memref<512x128xf32, #tpu.memory_space<vmem>>, vector<512x128xf32>
      %cst_42 = arith.constant dense<0.000000e+00> : vector<8x128xf32>
      %42 = tpu.matmul %40, %41, %cst_42 {dimension_numbers = #tpu.dot_dimension_numbers<[1], [0], [0], [1], [0, 0, 1, 1], [], []>} : vector<8x512xf32>, vector<512x128xf32>, vector<8x128xf32> -> vector<8x128xf32>
      %c0_43 = arith.constant 0 : index
      %c0_44 = arith.constant 0 : index
      %43 = vector.load %arg9[%c0_43, %c0_44] : memref<1x128xf32, #tpu.memory_space<vmem>>, vector<1x128xf32>
      %44 = vector.broadcast %43 : vector<1x128xf32> to vector<8x128xf32>
      %45 = arith.addf %42, %44 : vector<8x128xf32>
      %c0_45 = arith.constant 0 : index
      %c0_46 = arith.constant 0 : index
      %c0_47 = arith.constant 0 : index
      %46 = vector.load %arg10[%c0_45, %c0_46, %c0_47] : memref<1x8x128xf32, #tpu.memory_space<vmem>>, vector<1x8x128xf32>
      %47 = vector.shape_cast %46 : vector<1x8x128xf32> to vector<8x128xf32>
      %48 = vector.shape_cast %45 : vector<8x128xf32> to vector<1x8x128xf32>
      tpu.vector_store %arg10[%c0_45, %c0_46, %c0_47], %48 {strides = array<i32>} : memref<1x8x128xf32, #tpu.memory_space<vmem>>, vector<1x8x128xf32>,
    } else {
    }
    return
  }
  func.func @transform_0(%arg0: i32, %arg1: i32, %arg2: i32) -> (i32, i32, i32) {
    %c0_i32 = arith.constant 0 : i32
    %c0_i32_0 = arith.constant 0 : i32
    return %arg0, %arg1, %c0_i32 : i32, i32, i32
  }
  func.func @transform_1(%arg0: i32, %arg1: i32, %arg2: i32) -> (i32, i32, i32, i32) {
    %c0_i32 = arith.constant 0 : i32
    %c0_i32_0 = arith.constant 0 : i32
    %c0_i32_1 = arith.constant 0 : i32
    return %arg0, %c0_i32, %arg2, %c0_i32_0 : i32, i32, i32, i32
  }
  func.func @transform_2(%arg0: i32, %arg1: i32, %arg2: i32) -> (i32, i32, i32, i32) {
    %c0_i32 = arith.constant 0 : i32
    %c0_i32_0 = arith.constant 0 : i32
    %c0_i32_1 = arith.constant 0 : i32
    return %arg0, %c0_i32, %arg2, %c0_i32_0 : i32, i32, i32, i32
  }
  func.func @transform_3(%arg0: i32, %arg1: i32, %arg2: i32) -> (i32, i32) {
    %c0_i32 = arith.constant 0 : i32
    %c0_i32_0 = arith.constant 0 : i32
    %c0_i32_1 = arith.constant 0 : i32
    return %c0_i32, %c0_i32_0 : i32, i32
  }
  func.func @transform_4(%arg0: i32, %arg1: i32, %arg2: i32) -> (i32, i32) {
    %c0_i32 = arith.constant 0 : i32
    %c0_i32_0 = arith.constant 0 : i32
    %c0_i32_1 = arith.constant 0 : i32
    return %c0_i32, %c0_i32_0 : i32, i32
  }
  func.func @transform_5(%arg0: i32, %arg1: i32, %arg2: i32) -> (i32, i32) {
    %c0_i32 = arith.constant 0 : i32
    %c0_i32_0 = arith.constant 0 : i32
    %c0_i32_1 = arith.constant 0 : i32
    return %c0_i32, %c0_i32_0 : i32, i32
  }
  func.func @transform_6(%arg0: i32, %arg1: i32, %arg2: i32) -> (i32, i32) {
    %c0_i32 = arith.constant 0 : i32
    %c0_i32_0 = arith.constant 0 : i32
    %c0_i32_1 = arith.constant 0 : i32
    return %c0_i32, %c0_i32_0 : i32, i32
  }
  func.func @transform_7(%arg0: i32, %arg1: i32, %arg2: i32) -> (i32, i32, i32) {
    %c0_i32 = arith.constant 0 : i32
    %c0_i32_0 = arith.constant 0 : i32
    return %arg0, %arg1, %c0_i32 : i32, i32, i32
  }
}

</mosaic_0001>

<bundles_post_ra>
// kernel: tpu_custom_call.1
= control target key start
LH: loop header
LB: loop body
LE: loop exit
PB: predicated region body
PF: predicated region fallthrough
CT: control target
= control target key end

     0   :  { %s3261_s0 = inlined_call_operand.hbm [shape: f32[2,8,128], index: 0, kind: input, shape index: {}]   ;;  %s3262_s1 = inlined_call_operand.hbm [shape: f32[2,4,8,128], index: 1, kind: input, shape index: {}]   ;;  %s3263_s2 = inlined_call_operand.hbm [shape: f32[2,4,8,128], index: 2, kind: input, shape index: {}]   ;;  %s3264_s3 = inlined_call_operand.hbm [shape: f32[128,512], index: 3, kind: input, shape index: {}]   ;;  %s3265_s4 = inlined_call_operand.vmem [shape: f32[1,512], index: 4, kind: input, shape index: {}]   ;;  %s3266_s5 = inlined_call_operand.hbm [shape: f32[512,128], index: 5, kind: input, shape index: {}]   ;;  %s3267_s6 = inlined_call_operand.vmem [shape: f32[1,128], index: 6, kind: input, shape index: {}]   ;;  %s3268_s7 = inlined_call_operand.hbm [shape: f32[2,8,128], index: 7, kind: output, shape index: {}]  }
   0x1   :  { %3291 = sst [smem:[#allocation28_spill]] %s3262_s1 }
   0x2   :  { %3292 = sst [smem:[#allocation29_spill]] %s3264_s3 }
   0x3   :  { %3293 = sst [smem:[#allocation30_spill]] %s3265_s4 }
   0x4   :  { %3294 = sst [smem:[#allocation31_spill]] %s3267_s6 }
   0x5   :  { %3295 = sst [smem:[#allocation32_spill]] %s3268_s7 }
   0x6   :  { %12 = vsyncpa [#allocation7], 0 }
   0x7   :  { %14 = vsyncpa [#allocation7 + $0x1], 0 }
   0x8   :  { %15 = vsyncpa [#allocation10], 0 }
   0x9   :  { %17 = vsyncpa [#allocation10 + $0x1], 0 }
   0xa   :  { %18 = vsyncpa [#allocation13], 0 }
   0xb   :  { %19 = vsyncpa [#allocation8], 0 }
   0xc   :  { %21 = vsyncpa [#allocation8 + $0x1], 0  ;;  %s2798_s24 = smov 0   ;;  %s2800_s25 = smov 0  }
   0xd   :  { %s2802_s26 = smov 0   ;;  %s2804_s27 = smov 0  }
   0xe   :  { %s2806_s28 = smov 0   ;;  %s2808_s29 = smov 0  }
   0xf LB: > { %3296 = sst [smem:[#allocation20_spill]] %s2720_s24  ;;  %s2829_s30 = sadd.s32 4294967295, %s2740_s29   ;;  %s2740_s29 = sphi %s2808_s29, %s27_s29   ;;  %s2736_s28 = sphi %s2806_s28, %s3346_s28   ;;  %s2732_s27 = sphi %s2804_s27, %s3345_s27   ;;  %s2728_s26 = sphi %s2802_s26, %s3341_s26   ;;  %s2724_s25 = sphi %s2800_s25, %s3344_s25   ;;  %s2720_s24 = sphi %s2798_s24, %s3343_s24  }
  0x10   : > { %3297 = sst [smem:[#allocation21_spill]] %s2728_s26  ;;  %s2086_s8 = sadd.s32 4294967294, %s2740_s29  }
  0x11   : > { %3298 = sst [smem:[#allocation22_spill]] %s2732_s27  ;;  %p62_p0 = scmp.ne.s32.totalorder %s2728_s26, %s2724_s25 }
  0x12   : > { %3299 = sst [smem:[#allocation23_spill]] %s2740_s29  ;;  %p63_p1 = scmp.eq.s32.totalorder %s2740_s29, 0 }
  0x13   : > { %p68_p2 = scmp.ne.s32.totalorder %s2724_s25, %s2720_s24  ;;  %p3270_p3 = scmp.eq.s32.totalorder %s2829_s30, 0 }
  0x14   : > { %p234_p4 = scmp.eq.s32.totalorder %s2829_s30, 1  ;;  %p2840_p5 = por %p63_p1, %p62_p0 }
  0x15   : > { %p240_p6 = scmp.eq.s32.totalorder %s2086_s8, 1  ;;  %p2846_p7 = por %p3270_p3, %p68_p2 }
  0x16   : > { %s3300_s10 = scalar_select %p2840_p5, 1, 0 }
  0x17   : > { %s3301_s11 = scalar_select %p2846_p7, 1, 0 }
  0x18   : > { %p2850_p8 = por %p234_p4, %p62_p0  ;;  %p2854_p9 = por %p240_p6, %p68_p2 }
  0x19   : > { %p2087_p10 = scmp.ge.s32.totalorder %s2740_s29, 1  ;;  %p247_p11 = scmp.lt.s32.totalorder %s2740_s29, 3 }
  0x1a   : > { %s3302_s12 = scalar_select %p2850_p8, 1, 0 }
  0x1b   : > { %s3304_s13 = scalar_select %p2854_p9, 1, 0 }
  0x1c   : > { %3303 = sst [smem:[#allocation24_spill]] %s3302_s12  ;;  %p2860_p12 = pnand %p2087_p10, %p247_p11 }
  0x1d   : > { %3305 = sst [smem:[#allocation25_spill]] %s3304_s13  ;;  %s2742_s15 = smov [#allocation12]  }
  0x1e   : > { %s3306_s14 = scalar_select %p2860_p12, 1, 0 }
  0x1f   : > { %s259_s16 = sshll.u32 %s2742_s15, 4  ;;  %p2391_p13 = pneg %p2860_p12  ;;  %s260_s16 = int_to_ptr.vmem [resolvable:$true] %s259_s16 }
  0x20   : > { %s46_s18 = sadd.s32 1, %s2736_s28  ;;  %s3309_s3 = sld [smem:[#allocation29_spill]] }
  0x21   : > { %p2869_p1 = pnand %p2391_p13, %p3270_p3  ;;  %p2874_p2 = scmp.ge.s32.totalorder %s46_s18, 2 }
  0x23   : > { %s3307_s17 = scalar_select %p2869_p1, 1, 0 }
  0x24   : > { %s3308_s19 = scalar_select %p2874_p2, 1, 0 }
  0x25   : > { %p3278_p6 = pneg %p2869_p1 }
  0x26   : > { %s2504_s22 = scalar_lea.hbm %s3309_s3, 8192 }
  0x27   : > { %p2505_p4 = scmp.ne.s32.totalorder %s3309_s3, %s2504_s22  ;;  %p2511_p13 = scmp.lt.u32.totalorder %s2504_s22, %s3309_s3 }
  0x29   : > { %p2507_p10 = pnand %p3278_p6, %p2505_p4 }
  0x2b   : > { %p2508_p11 = pneg %p2507_p10 }
  0x2d   : > { %p2513_p0 = pnand %p2511_p13, %p2508_p11 }
  0x2f   : > { %2516 = shalt.err (!%p2513_p0)
}
  0x30   : > { %s2517_s13 = scalar_lea.vmem %s260_s16, 8192  ;;  %p2525_p7 = scmp.lt.s32.totalorder %s260_s16, %s260_s16 }
  0x31   : > { %p2518_p3 = scmp.ne.s32.totalorder %s260_s16, %s2517_s13  ;;  %p2526_p12 = scmp.lt.s32.totalorder %s2517_s13, %s2517_s13 }
  0x33   : > { %p2520_p9 = pnand %p2518_p3, %p3278_p6  ;;  %p2527_p5 = por %p2526_p12, %p2525_p7 }
  0x35   : > { %p2521_p8 = pneg %p2520_p9 }
  0x37   : > { %p2528_p2 = pnand %p2527_p5, %p2521_p8 }
  0x39   : > { %2531 = shalt.err (!%p2528_p2)
}
  0x3a   : > { %s2743_s20 = smov 512   ;;  %s2744_s9 = smov 32  }
  0x3b   : > { %2394 = dma.hbm_to_vmem [thread:$0]  (!%p2869_p1), %s3309_s3, 8192, %s260_s16, [#allocation13], %s2743_s20, %s2743_s20, %s2744_s9  }
  0x3c   : > { %p3310_p3 = scmp.ne.s32.totalorder %s3308_s19, 0  ;;  %p2414_p5 = scmp.lt.s32.totalorder %s2740_s29, 2 }
  0x3d   : > { %s2906_s13 = sand.u32 1, %s2728_s26   ;;  %s311_s8 = sand.u32 1, %s2740_s29  }
  0x3e   : > { %s3348_s18 = smov (%p3310_p3, %s46_s18), 0  ;;  %p3312_p8 = scmp.ne.s32.totalorder %s3300_s10, 0 }
  0x3f   : > { %3311 = sst [smem:[#allocation26_spill]] %s3348_s18  ;;  %s50_s23 = ssub.s32 %s2736_s28, %s3348_s18 }
  0x40   : > { %p53_p7 = scmp.eq.s32.totalorder %s50_s23, 0  ;;  %p2913_p9 = pnand %p2414_p5, %p3312_p8 }
  0x41   : > { %s3276_s21 = sshll.u32 %s2906_s13, 5  ;;  %s3314_s16 = sadd.s32 1, %s2728_s26 }
  0x42   : > { %s3313_s15 = scalar_select %p2913_p9, 1, 0 }
  0x43   : > { %s2921_s19 = scalar_select %p53_p7, %s2728_s26, %s3314_s16  }
  0x44   : > { %s3277_s20 = sshll.u32 %s2736_s28, 9  ;;  %s315_s9 = scalar_lea.vmem [#allocation9], %s3276_s21 }
  0x45   : > { %3315 = sst [smem:[#allocation27_spill]] %s2921_s19  ;;  %s323_s22 = sshll.u32 %s315_s9, 4  ;;  %s2933_s22 = int_to_ptr.vmem [resolvable:$true] %s323_s22 }
  0x46   : > { %s3316_s1 = sld [smem:[#allocation28_spill]]  ;;  %s2935_s10 = scalar_lea.sflag [#allocation10], %s311_s8 }
  0x47   : > { %p2941_p0 = pneg %p2913_p9 }
  0x49   : > { %s3317_s16 = scalar_select %p2941_p0, 1, 0 }
  0x4c   : > { %s2931_s18 = scalar_lea.hbm %s3316_s1, %s3277_s20  ;;  %s2537_s9 = scalar_lea.hbm %s3316_s1, 1024 }
  0x4d   : > { %s2532_s23 = scalar_lea.hbm %s2931_s18, 512  ;;  %p2538_p10 = scmp.lt.u32.totalorder %s2931_s18, %s3316_s1 }
  0x4e   : > { %p2533_p12 = scmp.ne.s32.totalorder %s2931_s18, %s2532_s23  ;;  %p2539_p11 = scmp.lt.u32.totalorder %s2537_s9, %s2532_s23 }
  0x4f   : > { %p2541_p3 = scmp.lt.u32.totalorder %s2532_s23, %s2931_s18 }
  0x50   : > { %p2535_p2 = pnand %p2941_p0, %p2533_p12  ;;  %p2540_p13 = por %p2539_p11, %p2538_p10 }
  0x52   : > { %p2536_p4 = pneg %p2535_p2  ;;  %p2542_p5 = por %p2541_p3, %p2540_p13 }
  0x54   : > { %p2543_p7 = pnand %p2542_p5, %p2536_p4 }
  0x56   : > { %2546 = shalt.err (!%p2543_p7)
}
  0x57   : > { %s2547_s8 = scalar_lea.vmem %s2933_s22, 512  ;;  %s2745_s3 = smov [#allocation9]  }
  0x58   : > { %p2548_p8 = scmp.ne.s32.totalorder %s2933_s22, %s2547_s8  ;;  %s2552_s24 = sshll.u32 %s2745_s3, 4  ;;  %s2553_s24 = int_to_ptr.vmem [resolvable:$false] %s2552_s24 }
  0x59   : > { %s2554_s21 = scalar_lea.vmem %s2553_s24, 1024  ;;  %p2555_p6 = scmp.lt.s32.totalorder %s2933_s22, %s2553_s24 }
  0x5a   : > { %p2550_p12 = pnand %p2548_p8, %p2941_p0  ;;  %p2556_p1 = scmp.lt.s32.totalorder %s2554_s21, %s2547_s8 }
  0x5c   : > { %p2551_p2 = pneg %p2550_p12  ;;  %p2557_p10 = por %p2556_p1, %p2555_p6 }
  0x5e   : > { %p2558_p11 = pnand %p2557_p10, %p2551_p2 }
  0x60   : > { %2561 = shalt.err (!%p2558_p11)
}
  0x61   : > { %s2746_s20 = smov 128   ;;  %s2747_s23 = smov 8  }
  0x62   : > { %2404 = dma.hbm_to_vmem [thread:$0]  (!%p2913_p9), %s2931_s18, 512, %s2933_s22, %s2935_s10, %s2746_s20, %s2746_s20, %s2747_s23  }
  0x63   : > { %s3318_s9 = sshll.u32 %s2736_s28, 9  ;;  %s3319_s21 = sshll.u32 %s2906_s13, 5 }
  0x64   : > { %s2973_s24 = scalar_lea.hbm %s3263_s2, %s3318_s9  ;;  %s337_s1 = scalar_lea.vmem [#allocation11], %s3319_s21 }
  0x65   : > { %s345_s19 = sshll.u32 %s337_s1, 4  ;;  %s2748_s26 = smov [#allocation14]   ;;  %s3007_s19 = int_to_ptr.vmem [resolvable:$true] %s345_s19 }
  0x66   : > { %s275_s29 = sshll.u32 %s2748_s26, 4  ;;  %s2562_s6 = scalar_lea.hbm %s3266_s5, 8192  ;;  %s276_s29 = int_to_ptr.vmem [resolvable:$true] %s275_s29 }
  0x67   : > { %p2563_p1 = scmp.ne.s32.totalorder %s3266_s5, %s2562_s6  ;;  %p3320_p6 = scmp.ne.s32.totalorder %s3307_s17, 0 }
  0x68   : > { %p2569_p5 = scmp.lt.u32.totalorder %s2562_s6, %s3266_s5 }
  0x69   : > { %p3321_p4 = pneg %p3320_p6 }
  0x6b   : > { %p2565_p13 = pnand %p2563_p1, %p3321_p4 }
  0x6d   : > { %p2566_p3 = pneg %p2565_p13 }
  0x6f   : > { %p2571_p7 = pnand %p2569_p5, %p2566_p3 }
  0x71   : > { %2574 = shalt.err (!%p2571_p7)
}
  0x72   : > { %s2575_s1 = scalar_lea.vmem %s276_s29, 8192  ;;  %p3322_p12 = pmov %p3321_p4 }
  0x73   : > { %p2576_p8 = scmp.ne.s32.totalorder %s276_s29, %s2575_s1  ;;  %p2583_p11 = scmp.lt.s32.totalorder %s276_s29, %s276_s29 }
  0x74   : > { %p2584_p9 = scmp.lt.s32.totalorder %s2575_s1, %s2575_s1 }
  0x75   : > { %p2578_p2 = pnand %p2576_p8, %p3322_p12 }
  0x76   : > { %p2585_p0 = por %p2584_p9, %p2583_p11 }
  0x77   : > { %p2579_p10 = pneg %p2578_p2 }
  0x79   : > { %p2586_p1 = pnand %p2585_p0, %p2579_p10 }
  0x7b   : > { %2589 = shalt.err (!%p2586_p1)
}
  0x7c   : > { %2397 = dma.hbm_to_vmem [thread:$0]  (!%p3320_p6), %s3266_s5, 8192, %s276_s29, [#allocation13], %s2746_s20, %s2746_s20, %s2747_s23  }
  0x7d   : > { %s2091_s7 = sshll.u32 %s2906_s13, 3  ;;  %s2092_s26 = sshll.u32 %s2736_s28, 7 }
  0x7e   : > { %s3005_s9 = scalar_lea.hbm %s3261_s0, %s2092_s26  ;;  %s296_s17 = scalar_lea.vmem [#allocation6], %s2091_s7 }
  0x7f   : > { %s304_s3 = sshll.u32 %s296_s17, 4  ;;  %s293_s8 = scalar_lea.sflag [#allocation7], %s2906_s13  ;;  %s305_s3 = int_to_ptr.vmem [resolvable:$true] %s304_s3 }
  0x80   : > { %s2590_s21 = scalar_lea.hbm %s3005_s9, 128  ;;  %p3323_p0 = scmp.ne.s32.totalorder %s3317_s16, 0 }
  0x81   : > { %p2591_p9 = scmp.ne.s32.totalorder %s3005_s9, %s2590_s21  ;;  %s2595_s22 = scalar_lea.hbm %s3261_s0, 256 }
  0x82   : > { %p2596_p13 = scmp.lt.u32.totalorder %s3005_s9, %s3261_s0  ;;  %p2597_p3 = scmp.lt.u32.totalorder %s2595_s22, %s2590_s21 }
  0x83   : > { %p2593_p6 = pnand %p2591_p9, %p3323_p0  ;;  %p2599_p7 = scmp.lt.u32.totalorder %s2590_s21, %s3005_s9 }
  0x84   : > { %p2598_p5 = por %p2597_p3, %p2596_p13 }
  0x85   : > { %p2594_p4 = pneg %p2593_p6 }
  0x86   : > { %p2600_p8 = por %p2599_p7, %p2598_p5 }
  0x88   : > { %p2601_p12 = pnand %p2600_p8, %p2594_p4 }
  0x8a   : > { %2604 = shalt.err (!%p2601_p12)
}
  0x8b   : > { %s2605_s13 = scalar_lea.vmem %s305_s3, 128  ;;  %s2749_s6 = smov [#allocation6]  }
  0x8c   : > { %p2606_p2 = scmp.ne.s32.totalorder %s305_s3, %s2605_s13  ;;  %s2610_s7 = sshll.u32 %s2749_s6, 4  ;;  %s2611_s7 = int_to_ptr.vmem [resolvable:$false] %s2610_s7 }
  0x8d   : > { %s2612_s26 = scalar_lea.vmem %s2611_s7, 256  ;;  %p2613_p1 = scmp.lt.s32.totalorder %s305_s3, %s2611_s7 }
  0x8e   : > { %p2608_p10 = pnand %p2606_p2, %p3323_p0  ;;  %p2614_p9 = scmp.lt.s32.totalorder %s2612_s26, %s2605_s13 }
  0x90   : > { %p2609_p11 = pneg %p2608_p10  ;;  %p2615_p6 = por %p2614_p9, %p2613_p1 }
  0x92   : > { %p2616_p3 = pnand %p2615_p6, %p2609_p11 }
  0x94   : > { %2619 = shalt.err (!%p2616_p3)
}
  0x95   : > { %p3324_p13 = scmp.ne.s32.totalorder %s3313_s15, 0  ;;  %s2620_s27 = scalar_lea.hbm %s2973_s24, 512 }
  0x96   : > { %p2621_p4 = scmp.ne.s32.totalorder %s2973_s24, %s2620_s27  ;;  %s2625_s21 = scalar_lea.hbm %s3263_s2, 1024 }
  0x97   : > { %2401 = dma.hbm_to_vmem [thread:$0]  (!%p3324_p13), %s3005_s9, 128, %s305_s3, %s293_s8  }
  0x98   : > { %p2623_p5 = pnand %p2621_p4, %p3323_p0  ;;  %p2626_p8 = scmp.lt.u32.totalorder %s2973_s24, %s3263_s2 }
  0x99   : > { %p2627_p12 = scmp.lt.u32.totalorder %s2625_s21, %s2620_s27  ;;  %p2629_p10 = scmp.lt.u32.totalorder %s2620_s27, %s2973_s24 }
  0x9a   : > { %p2624_p7 = pneg %p2623_p5 }
  0x9b   : > { %p2628_p2 = por %p2627_p12, %p2626_p8 }
  0x9d   : > { %p2630_p11 = por %p2629_p10, %p2628_p2 }
  0x9f   : > { %p2631_p1 = pnand %p2630_p11, %p2624_p7 }
  0xa1   : > { %2634 = shalt.err (!%p2631_p1)
}
  0xa2   : > { %s2635_s9 = scalar_lea.vmem %s3007_s19, 512  ;;  %s2750_s3 = smov [#allocation11]  }
  0xa3   : > { %p2636_p9 = scmp.ne.s32.totalorder %s3007_s19, %s2635_s9  ;;  %s2640_s8 = sshll.u32 %s2750_s3, 4  ;;  %s2641_s8 = int_to_ptr.vmem [resolvable:$false] %s2640_s8 }
  0xa4   : > { %s2642_s22 = scalar_lea.vmem %s2641_s8, 1024  ;;  %p2643_p4 = scmp.lt.s32.totalorder %s3007_s19, %s2641_s8 }
  0xa5   : > { %p2638_p6 = pnand %p2636_p9, %p3323_p0  ;;  %p2644_p5 = scmp.lt.s32.totalorder %s2642_s22, %s2635_s9 }
  0xa7   : > { %p2639_p3 = pneg %p2638_p6  ;;  %p2645_p8 = por %p2644_p5, %p2643_p4 }
  0xa9   : > { %p2646_p12 = pnand %p2645_p8, %p2639_p3 }
  0xab   : > { %2649 = shalt.err (!%p2646_p12)
}
  0xac   : > { %2407 = dma.hbm_to_vmem [thread:$0]  (!%p3324_p13), %s2973_s24, 512, %s3007_s19, %s2935_s10, %s2746_s20, %s2746_s20, %s2747_s23  }
  0xad   : > { %p3325_p0 = scmp.ne.s32.totalorder %s3306_s14, 0 }
  0xae   : > { %s3055_s16 = sand.u32 (!%p3325_p0), 1, %s2724_s25   ;;  %p3326_p7 = scmp.ne.s32.totalorder (!%p3325_p0), %s3301_s11, 0 }
  0xaf   : > { %357 = sbr.rel (%p3325_p0) target bundleno = 1517 (0x5ed), region = 48  ;;  %s2100_s1 = sshll.u32 (!%p3325_p0), %s3055_s16, 3 }
  0xb0   : > { %s360_s4 = scalar_lea.sflag (!%p3325_p0), [#allocation7], %s3055_s16  ;;  %s3061_s15 = scalar_lea.vmem (!%p3325_p0), [#allocation6], %s2100_s1 }
  0xb6   : > { %2703 = dma.done.wait (%p3326_p7), %s360_s4, 128  }
  0xb7   : > { %2705 = vsyncadd (%p3326_p7), %s360_s4, 4294967168  ;;  %s368_s14 = sand.u32 1, %s2829_s30   ;;  %s2101_s19 = sshll.u32 %s3055_s16, 5 }
  0xb8   : > { %s369_s10 = scalar_lea.sflag [#allocation10], %s368_s14  ;;  %s3069_s20 = scalar_lea.vmem [#allocation9], %s2101_s19 }
  0xb9   : > { %2707 = dma.done.wait (%p3326_p7), %s369_s10, 1024  }
  0xba   : > { %2709 = vsyncadd (%p3326_p7), %s369_s10, 4294966272  ;;  %s3075_s23 = scalar_lea.vmem [#allocation11], %s2101_s19  ;;  %p3327_p13 = scmp.eq.s32.totalorder %s2829_s30, 0 }
  0xbc   : > { %2711 = dma.done.wait (%p3327_p13), [#allocation13], 16384   ;;  %p3328_p2 = pmov %p3327_p13 }
  0xbd   : > { %v2751_v0 = vmov 0.0   ;;  %v436_v1 = vld [vmem:[#allocation12 + $0x8] sm:$0xff]  ;;  %v438_v3 = vld [vmem:[#allocation12 + $0x18] sm:$0xff]  ;;  %v435_v6 = vld [vmem:[#allocation12] sm:$0xff]  ;;  %vm2752_vm0 = vmmov 0   ;;  %s3329_s24 = sld [smem:[#allocation30_spill]] }
  0xbe   : > { %2713 = vsyncadd (%p3328_p2), [#allocation13], 4294950912  ;;  %585 = vmatprep.mubr.f32.mxu0 %v2751_v0  ;;  %656 = vmatprep.mubr.f32.mxu1 %v2751_v0  ;;  %v440_v2 = vld [vmem:[#allocation12 + $0x28] sm:$0xff]  ;;  %v442_v5 = vld [vmem:[#allocation12 + $0x38] sm:$0xff]  ;;  %vm803_vm1 = vcmask 7168   ;;  %vm1112_vm2 = vcmask 64512  }
  0xbf   : > { %v2247_v4 = vpack.c.bf16 %v440_v2, %v436_v1  ;;  %v439_v7 = vld [vmem:[#allocation12 + $0x20] sm:$0xff]  ;;  %v2279_v8 = vpack.c.bf16 %v442_v5, %v438_v3  ;;  %v437_v10 = vld [vmem:[#allocation12 + $0x10] sm:$0xff]  ;;  %v444_v12 = vld [vmem:[#allocation12 + $0x48] sm:$0xff]  ;;  %808 = vst.msk [vmem:[#allocation4] sm:$0xff] %vm803_vm1, %v2751_v0  ;;  %s3330_s13 = sld [smem:[#allocation22_spill]]  ;;  %s3331_s26 = sld [smem:[#allocation31_spill]] }
  0xc0   : > { %v2249_v9 = vpack.c.bf16 %v439_v7, %v435_v6  ;;  %v441_v11 = vld [vmem:[#allocation12 + $0x30] sm:$0xff]  ;;  %v448_v14 = vld [vmem:[#allocation12 + $0x68] sm:$0xff]  ;;  %v446_v15 = vld [vmem:[#allocation12 + $0x58] sm:$0xff]  ;;  %809 = vst.msk [vmem:[#allocation4 + $0x8] sm:$0xff] %vm803_vm1, %v2751_v0  ;;  %s3332_s27 = sld [smem:[#allocation24_spill]]  ;;  %s429_s17 = scalar_lea.vmem [#allocation15], %s2100_s1 }
  0xc1   : > { %2248 = vmatprep.subr.bf16.mxu0 %v2247_v4  ;;  %v2281_v13 = vpack.c.bf16 %v441_v11, %v437_v10  ;;  %v450_v16 = vld [vmem:[#allocation12 + $0x78] sm:$0xff]  ;;  %2280 = vmatprep.subr.bf16.mxu1 %v2279_v8  ;;  %v2251_v17 = vpack.c.bf16 %v448_v14, %v444_v12  ;;  %v443_v19 = vld [vmem:[#allocation12 + $0x40] sm:$0xff]  ;;  %v445_v21 = vld [vmem:[#allocation12 + $0x50] sm:$0xff]  ;;  %810 = vst.msk [vmem:[#allocation4 + $0x10] sm:$0xff] %vm803_vm1, %v2751_v0  ;;  %s1936_s21 = sshll.u32 %s429_s17, 4  ;;  %s3333_s9 = sld [smem:[#allocation32_spill]]  ;;  %s3214_s21 = int_to_ptr.vmem [resolvable:$true] %s1936_s21 }
  0xc2   : > { %2250 = vmatpush1.bf16.msra.mxu0 %v2249_v9  ;;  %v2283_v18 = vpack.c.bf16 %v450_v16, %v446_v15  ;;  %v447_v20 = vld [vmem:[#allocation12 + $0x60] sm:$0xff]  ;;  %v449_v23 = vld [vmem:[#allocation12 + $0x70] sm:$0xff]  ;;  %v452_v24 = vld [vmem:[#allocation12 + $0x88] sm:$0xff]  ;;  %811 = vst.msk [vmem:[#allocation4 + $0x18] sm:$0xff] %vm803_vm1, %v2751_v0  ;;  %s1922_s8 = scalar_lea.sflag [#allocation8], %s3055_s16  ;;  %s2650_s22 = scalar_lea.vmem %s3214_s21, 128 }
  0xc3   : > { %2282 = vmatpush1.bf16.msra.mxu1 %v2281_v13  ;;  %v2253_v22 = vpack.c.bf16 %v447_v20, %v443_v19  ;;  %v456_v25 = vld [vmem:[#allocation12 + $0xa8] sm:$0xff]  ;;  %2252 = vmatprep.subr.bf16.mxu0 %v2251_v17  ;;  %v2285_v26 = vpack.c.bf16 %v449_v23, %v445_v21  ;;  %v454_v28 = vld [vmem:[#allocation12 + $0x98] sm:$0xff]  ;;  %v451_v30 = vld [vmem:[#allocation12 + $0x80] sm:$0xff]  ;;  %p2651_p10 = scmp.ne.s32.totalorder %s3214_s21, %s2650_s22  ;;  %s2757_s1 = smov [#allocation15]  }
  0xc4   : > { %2284 = vmatprep.subr.bf16.mxu1 %v2283_v18  ;;  %v2255_v27 = vpack.c.bf16 %v456_v25, %v452_v24  ;;  %v458_v29 = vld [vmem:[#allocation12 + $0xb8] sm:$0xff]  ;;  %v455_v32 = vld [vmem:[#allocation12 + $0xa0] sm:$0xff]  ;;  %v453_v33 = vld [vmem:[#allocation12 + $0x90] sm:$0xff]  ;;  %s2654_s4 = sshll.u32 %s2757_s1, 4  ;;  %s2655_s4 = int_to_ptr.vmem [resolvable:$false] %s2654_s4 }
  0xc5   : > { %v2287_v31 = vpack.c.bf16 %v458_v29, %v454_v28  ;;  %v457_v34 = vld [vmem:[#allocation12 + $0xb0] sm:$0xff]  ;;  %v2257_v35 = vpack.c.bf16 %v455_v32, %v451_v30  ;;  %v460_v36 = vld [vmem:[#allocation12 + $0xc8] sm:$0xff]  ;;  %v462_v38 = vld [vmem:[#allocation12 + $0xd8] sm:$0xff]  ;;  %s2116_s12 = sshll.u32 %s3330_s13, 7  ;;  %p2657_p6 = scmp.lt.s32.totalorder %s3214_s21, %s2655_s4 }
  0xc6   : > { %2254 = vmatpush1.bf16.msra.mxu0 %v2253_v22  ;;  %v464_v37 = vld [vmem:[#allocation12 + $0xe8] sm:$0xff]  ;;  %v2289_v39 = vpack.c.bf16 %v457_v34, %v453_v33  ;;  %v466_v41 = vld [vmem:[#allocation12 + $0xf8] sm:$0xff]  ;;  %v459_v42 = vld [vmem:[#allocation12 + $0xc0] sm:$0xff]  ;;  %p3334_p11 = scmp.ne.s32.totalorder %s3332_s27, 0 }
  0xc7   : > { %2286 = vmatpush1.bf16.msra.mxu1 %v2285_v26  ;;  %2256 = vmatprep.subr.bf16.mxu0 %v2255_v27  ;;  %v2259_v40 = vpack.c.bf16 %v464_v37, %v460_v36  ;;  %v463_v43 = vld [vmem:[#allocation12 + $0xe0] sm:$0xff]  ;;  %v2291_v44 = vpack.c.bf16 %v466_v41, %v462_v38  ;;  %v461_v45 = vld [vmem:[#allocation12 + $0xd0] sm:$0xff]  ;;  %v468_v47 = vld [vmem:[#allocation12 + $0x108] sm:$0xff]  ;;  %v501_v37 = vlaneseq  ;;  %v2753_v41 = vmov 1983009808   ;;  %s3212_s3 = scalar_lea.hbm %s3333_s9, %s2116_s12 }
  0xc8   : > { %2288 = vmatprep.subr.bf16.mxu1 %v2287_v31  ;;  %v465_v46 = vld [vmem:[#allocation12 + $0xf0] sm:$0xff]  ;;  %v472_v48 = vld [vmem:[#allocation12 + $0x128] sm:$0xff]  ;;  %v470_v49 = vld [vmem:[#allocation12 + $0x118] sm:$0xff]  ;;  %v2261_v51 = vpack.c.bf16 %v463_v43, %v459_v42  ;;  %v666_v42 = vunpack.c.l.s4 %v2753_v41  ;;  %p2652_p1 = pnand %p2651_p10, %p3334_p11 }
  0xc9   : > { %v474_v50 = vld [vmem:[#allocation12 + $0x138] sm:$0xff]  ;;  %v2293_v52 = vpack.c.bf16 %v465_v46, %v461_v45  ;;  %v2263_v53 = vpack.c.bf16 %v472_v48, %v468_v47  ;;  %v467_v54 = vld [vmem:[#allocation12 + $0x100] sm:$0xff]  ;;  %v469_v56 = vld [vmem:[#allocation12 + $0x110] sm:$0xff]  ;;  %v502_v38 = vshrl.u32 %v501_v37, 7 }
  0xca   : > { %2258 = vmatpush1.bf16.msra.mxu0 %v2257_v35  ;;  %v471_v55 = vld [vmem:[#allocation12 + $0x120] sm:$0xff]  ;;  %v2295_v57 = vpack.c.bf16 %v474_v50, %v470_v49  ;;  %v473_v58 = vld [vmem:[#allocation12 + $0x130] sm:$0xff]  ;;  %v476_v59 = vld [vmem:[#allocation12 + $0x148] sm:$0xff]  ;;  %v667_v47 = vunpack.c.0.s8 %v666_v42  ;;  %v2754_v50 = vmov 1934713408   ;;  %p2653_p9 = pneg %p2652_p1 }
  0xcb   : > { %2290 = vmatpush1.bf16.msra.mxu1 %v2289_v39  ;;  %2260 = vmatprep.subr.bf16.mxu0 %v2259_v40  ;;  %v480_v60 = vld [vmem:[#allocation12 + $0x168] sm:$0xff]  ;;  %v478_v61 = vld [vmem:[#allocation12 + $0x158] sm:$0xff]  ;;  %v2265_v63 = vpack.c.bf16 %v471_v55, %v467_v54  ;;  %v2297_v1 = vpack.c.bf16 %v473_v58, %v469_v56  ;;  %v475_v3 = vld [vmem:[#allocation12 + $0x140] sm:$0xff]  ;;  %v503_v39 = vsub.s32 0, %v502_v38  ;;  %v511_v43 = vsub.s32 2, %v502_v38 }
  0xcc   : > { %2292 = vmatprep.subr.bf16.mxu1 %v2291_v44  ;;  %v482_v62 = vld [vmem:[#allocation12 + $0x178] sm:$0xff]  ;;  %v2267_v2 = vpack.c.bf16 %v480_v60, %v476_v59  ;;  %v479_v4 = vld [vmem:[#allocation12 + $0x160] sm:$0xff]  ;;  %v477_v5 = vld [vmem:[#allocation12 + $0x150] sm:$0xff]  ;;  %v507_v44 = vsub.s32 1, %v502_v38  ;;  %v515_v45 = vsub.s32 3, %v502_v38 }
  0xcd   : > { %v2299_v6 = vpack.c.bf16 %v482_v62, %v478_v61  ;;  %v481_v7 = vld [vmem:[#allocation12 + $0x170] sm:$0xff]  ;;  %v484_v8 = vld [vmem:[#allocation12 + $0x188] sm:$0xff]  ;;  %v486_v10 = vld [vmem:[#allocation12 + $0x198] sm:$0xff]  ;;  %v2269_v12 = vpack.c.bf16 %v479_v4, %v475_v3 }
  0xce   : > { %2262 = vmatpush1.bf16.msra.mxu0 %v2261_v51  ;;  %v488_v9 = vld [vmem:[#allocation12 + $0x1a8] sm:$0xff]  ;;  %v490_v11 = vld [vmem:[#allocation12 + $0x1b8] sm:$0xff]  ;;  %v2301_v13 = vpack.c.bf16 %v481_v7, %v477_v5  ;;  %v483_v15 = vld [vmem:[#allocation12 + $0x180] sm:$0xff]  ;;  %v698_v51 = vunpack.c.l.s4 %v2754_v50 }
  0xcf   : > { %2294 = vmatpush1.bf16.msra.mxu1 %v2293_v52  ;;  %2264 = vmatprep.subr.bf16.mxu0 %v2263_v53  ;;  %v2271_v14 = vpack.c.bf16 %v488_v9, %v484_v8  ;;  %v487_v16 = vld [vmem:[#allocation12 + $0x1a0] sm:$0xff]  ;;  %v485_v17 = vld [vmem:[#allocation12 + $0x190] sm:$0xff]  ;;  %v2303_v18 = vpack.c.bf16 %v490_v11, %v486_v10  ;;  %v492_v20 = vld [vmem:[#allocation12 + $0x1c8] sm:$0xff] }
  0xd0   : > { %2296 = vmatprep.subr.bf16.mxu1 %v2295_v57  ;;  %v489_v19 = vld [vmem:[#allocation12 + $0x1b0] sm:$0xff]  ;;  %v496_v21 = vld [vmem:[#allocation12 + $0x1e8] sm:$0xff]  ;;  %v494_v22 = vld [vmem:[#allocation12 + $0x1d8] sm:$0xff]  ;;  %v2273_v24 = vpack.c.bf16 %v487_v16, %v483_v15  ;;  %v3097_v57 = vsub.s32 %v667_v47, %v502_v38  ;;  %v699_v61 = vunpack.c.0.s8 %v698_v51 }
  0xd1   : > { %v498_v23 = vld [vmem:[#allocation12 + $0x1f8] sm:$0xff]  ;;  %v2305_v25 = vpack.c.bf16 %v489_v19, %v485_v17  ;;  %v2275_v26 = vpack.c.bf16 %v496_v21, %v492_v20  ;;  %v491_v27 = vld [vmem:[#allocation12 + $0x1c0] sm:$0xff]  ;;  %v493_v30 = vld [vmem:[#allocation12 + $0x1d0] sm:$0xff] }
  0xd2   : > { %2266 = vmatpush1.bf16.msra.mxu0 %v2265_v63  ;;  %v495_v28 = vld [vmem:[#allocation12 + $0x1e0] sm:$0xff]  ;;  %v2307_v29 = vpack.c.bf16 %v498_v23, %v494_v22  ;;  %v497_v31 = vld [vmem:[#allocation12 + $0x1f0] sm:$0xff]  ;;  %v817_v36 = vld [vmem:[%s3069_s20 + $0x8] sm:$0xff] }
  0xd3   : > { %2298 = vmatpush1.bf16.msra.mxu1 %v2297_v1  ;;  %2268 = vmatprep.subr.bf16.mxu0 %v2267_v2  ;;  %v2277_v32 = vpack.c.bf16 %v495_v28, %v491_v27  ;;  %v2309_v33 = vpack.c.bf16 %v497_v31, %v493_v30  ;;  %v434_v34 = vld [vmem:[%s3061_s15] sm:$0xff]  ;;  %v816_v35 = vld [vmem:[%s3069_s20] sm:$0xff]  ;;  %s2656_s15 = scalar_lea.vmem %s2655_s4, 256 }
  0xd4   : > { %2300 = vmatprep.subr.bf16.mxu1 %v2299_v6  ;;  %v499_v40 = vld [vmem:[%s3329_s24] sm:$0xf]  ;;  %v3101_v6 = vsub.s32 %v699_v61, %v502_v38  ;;  %p2658_p3 = scmp.lt.s32.totalorder %s2656_s15, %s2650_s22 }
  0xd5   : > { %v504_v46 = vrot.slane %v499_v40, %v503_v39  ;;  %v512_v48 = vrot.slane %v499_v40, %v511_v43  ;;  %v508_v49 = vrot.slane %v499_v40, %v507_v44  ;;  %v516_v52 = vrot.slane %v499_v40, %v515_v45 }
  0xd6   : > { %2270 = vmatpush1.bf16.msra.mxu0 %v2269_v12  ;;  %v2755_v39 = vmov -inf   ;;  %p2659_p4 = por %p2658_p3, %p2657_p6 }
  0xd7   : > { %2302 = vmatpush1.bf16.msra.mxu1 %v2301_v13  ;;  %2272 = vmatprep.subr.bf16.mxu0 %v2271_v14  ;;  %804 = vst.msk [vmem:[#allocation3] sm:$0xff] %vm803_vm1, %v2755_v39  ;;  %805 = vst.msk [vmem:[#allocation3 + $0x8] sm:$0xff] %vm803_vm1, %v2755_v39 }
  0xd8   : > { %2304 = vmatprep.subr.bf16.mxu1 %v2303_v18  ;;  %806 = vst.msk [vmem:[#allocation3 + $0x10] sm:$0xff] %vm803_vm1, %v2755_v39  ;;  %807 = vst.msk [vmem:[#allocation3 + $0x18] sm:$0xff] %vm803_vm1, %v2755_v39  ;;  %v1173_v39 = vld [vmem:[#allocation4] sm:$0xff]  ;;  %p2660_p5 = pnand %p2659_p4, %p2653_p9 }
  0xda   : > { %2274 = vmatpush1.bf16.msra.mxu0 %v2273_v24 }
  0xdb   : > { %2306 = vmatpush1.bf16.msra.mxu1 %v2305_v25  ;;  %2276 = vmatprep.subr.bf16.mxu0 %v2275_v26 }
  0xdc   : > { %2308 = vmatprep.subr.bf16.mxu1 %v2307_v29 }
  0xde   : > { %2278 = vmatpush1.bf16.msra.mxu0 %v2277_v32 }
  0xdf   : > { %2310 = vmatpush1.bf16.msra.mxu1 %v2309_v33  ;;  %2207 = vmatprep.subr.mxu0 %v2751_v0 }
  0xe0   : > { %2212 = vmatprep.subr.mxu1 %v2751_v0 }
  0xe1   : > { %586 = vmatmul.mubr.f32.vlgmr.msra.gmra.mrb[0].mxu0 %v434_v34 }
  0xe2   : > { %657 = vmatmul.mubr.f32.vlgmr.msra.gmra.mrb[0].mxu1 %v434_v34  ;;  %2209 = vmatprep.mubr.msk.f32.mxu0 %vm2752_vm0, %v2751_v0 }
  0xe3   : > { %2214 = vmatprep.mubr.msk.f32.mxu1 %vm2752_vm0, %v2751_v0 }
  0xe7   : > { %2208 = vmatpush3.xpose.msra.mxu0 %v816_v35  ;;  %v818_v35 = vld [vmem:[%s3069_s20 + $0x10] sm:$0xff] }
  0xe8   : > { %2213 = vmatpush3.xpose.msra.mxu1 %v817_v36  ;;  %2217 = vmatprep.subr.mxu0 %v2751_v0  ;;  %v819_v36 = vld [vmem:[%s3069_s20 + $0x18] sm:$0xff] }
  0xe9   : > { %2222 = vmatprep.subr.mxu1 %v2751_v0 }
 0x1b4   : > { %v587_v53 = vpop.f32.mrb[0].mxu0 }
 0x1b5   : > { %v588_v54 = vadd.f32 %v587_v53, %v504_v46  ;;  %v658_v55 = vpop.f32.mrb[0].mxu1  ;;  %v589_v56 = vpop.f32.mrb[1].mxu0  ;;  %v3145_v53 = vld [vmem:[#allocation3] sm:$0xff] }
 0x1b6   : > { %v659_v58 = vadd.f32 %v658_v55, %v512_v48  ;;  %v590_v59 = vadd.f32 %v589_v56, %v508_v49  ;;  %v660_v60 = vpop.f32.mrb[1].mxu1  ;;  %v1109_v56 = vld [vmem:[#allocation3 + $0x8] sm:$0xff] }
 0x1b7   : > { %v661_v62 = vadd.f32 %v660_v60, %v516_v52  ;;  %v2756_v52 = vmov 0  }
 0x1b8   : > { %v663_v63 = vcombine.low %v588_v54, %v659_v58  ;;  %v664_v1 = vcombine.high %v588_v54, %v659_v58  ;;  %2478 = vset.pattern.permute.xlu0 %v2756_v52  ;;  %2479 = vset.pattern.permute.xlu1 %v2756_v52  ;;  %v3150_v58 = vld [vmem:[#allocation3 + $0x10] sm:$0xff] }
 0x1b9   : > { %v679_v2 = vcombine.low %v590_v59, %v661_v62  ;;  %v680_v3 = vcombine.high %v590_v59, %v661_v62 }
 0x1ba   : > { %v671_v4 = vrot.slane %v663_v63, %v3097_v57  ;;  %v678_v5 = vrot.slane %v664_v1, %v3097_v57  ;;  %v1111_v1 = vld [vmem:[#allocation3 + $0x18] sm:$0xff] }
 0x1bb   : > { %v687_v7 = vrot.slane %v679_v2, %v3097_v57  ;;  %v694_v8 = vrot.slane %v680_v3, %v3097_v57 }
 0x1bd   : > { %v695_v9 = vcombine.low %v671_v4, %v687_v7  ;;  %v696_v10 = vcombine.high %v671_v4, %v687_v7  ;;  %v711_v11 = vcombine.low %v678_v5, %v694_v8  ;;  %v712_v12 = vcombine.high %v678_v5, %v694_v8  ;;  %v820_v8 = vld [vmem:[%s3075_s23] sm:$0xff] }
 0x1bf   : > { %v703_v13 = vrot.slane %v695_v9, %v3101_v6  ;;  %v710_v14 = vrot.slane %v696_v10, %v3101_v6  ;;  %v719_v15 = vrot.slane %v711_v11, %v3101_v6  ;;  %v726_v16 = vrot.slane %v712_v12, %v3101_v6  ;;  %v821_v9 = vld [vmem:[%s3075_s23 + $0x8] sm:$0xff] }
 0x1c1   : > { %v731_v17 = vcombine.low %v703_v13, %v710_v14  ;;  %v2106_v18 = vcombine.high %v703_v13, %v710_v14  ;;  %v747_v19 = vcombine.low %v719_v15, %v726_v16  ;;  %v2107_v20 = vcombine.high %v719_v15, %v726_v16 }
 0x1c3   : > { %v738_v21 = vrot.slane %v731_v17, %v3097_v57  ;;  %v746_v22 = vrot.slane %v2106_v18, %v3097_v57  ;;  %v754_v23 = vrot.slane %v747_v19, %v3097_v57  ;;  %v762_v24 = vrot.slane %v2107_v20, %v3097_v57 }
 0x1c5   : > { %v763_v25 = vcombine.low %v738_v21, %v746_v22  ;;  %v779_v26 = vcombine.low %v754_v23, %v762_v24  ;;  %v764_v27 = vcombine.high %v738_v21, %v746_v22  ;;  %v780_v28 = vcombine.high %v754_v23, %v762_v24  ;;  %v822_v21 = vld [vmem:[%s3075_s23 + $0x10] sm:$0xff] }
 0x1c7   : > { %v771_v29 = vrot.slane %v763_v25, %v3101_v6  ;;  %v787_v30 = vrot.slane %v779_v26, %v3101_v6  ;;  %v778_v31 = vrot.slane %v764_v27, %v3101_v6  ;;  %v794_v32 = vrot.slane %v780_v28, %v3101_v6  ;;  %v823_v25 = vld [vmem:[%s3075_s23 + $0x18] sm:$0xff] }
 0x1c9   : > { %v795_v33 = vcombine.low %v771_v29, %v787_v30  ;;  %v796_v34 = vcombine.high %v771_v29, %v787_v30  ;;  %v797_v37 = vcombine.low %v778_v31, %v794_v32  ;;  %v798_v38 = vcombine.high %v778_v31, %v794_v32 }
 0x1cb   : > { %2210 = vmatmul.mubr.f32.vlgmr.msra.gmra.mrb[2].mxu0 %v795_v33  ;;  %2215 = vmatmul.mubr.f32.vlgmr.msra.gmra.mrb[2].mxu1 %v796_v34 }
 0x1cc   : > { %2218 = vmatpush3.xpose.msra.mxu0 %v818_v35  ;;  %2223 = vmatpush3.xpose.msra.mxu1 %v819_v36 }
 0x1cd   : > { %2219 = vmatprep.mubr.msk.f32.mxu0 %vm2752_vm0, %v2751_v0  ;;  %2224 = vmatprep.mubr.msk.f32.mxu1 %vm2752_vm0, %v2751_v0 }
 0x1ce   : > { %2227 = vmatprep.subr.mxu0 %v2751_v0  ;;  %2232 = vmatprep.subr.mxu1 %v2751_v0 }
 0x1cf   : > { %2220 = vmatmul.mubr.f32.vlgmr.msra.gmra.mrb[4].mxu0 %v797_v37  ;;  %2225 = vmatmul.mubr.f32.vlgmr.msra.gmra.mrb[4].mxu1 %v798_v38 }
 0x1d0   : > { %2229 = vmatprep.mubr.msk.f32.mxu0 %vm2752_vm0, %v2751_v0  ;;  %2234 = vmatprep.mubr.msk.f32.mxu1 %vm2752_vm0, %v2751_v0 }
 0x1d1   : > { %2228 = vmatpush3.msra.mxu0 %v820_v8  ;;  %2233 = vmatpush3.msra.mxu1 %v821_v9  ;;  %v1742_v8 = vld [vmem:[#allocation14 + $0x108] sm:$0xff] }
 0x1d2   : > { %2237 = vmatprep.subr.mxu0 %v2751_v0  ;;  %2242 = vmatprep.subr.mxu1 %v2751_v0 }
 0x29e   : > { %v894_v40 = vpop.f32.mrb[2].mxu0  ;;  %v964_v41 = vpop.f32.mrb[2].mxu1 }
 0x29f   : > { %v2211_v42 = vpop.f32.mrb[3].mxu0  ;;  %v2216_v43 = vpop.f32.mrb[3].mxu1  ;;  %v1113_v44 = vsel %vm1112_vm2, %v894_v40, -inf  ;;  %v1116_v49 = vsel %vm1112_vm2, %v964_v41, -inf }
 0x2a0   : > { %1114 = vmax.xlane.f32.xlu0 %v1113_v44  ;;  %v1174_v42 = vld [vmem:[#allocation4 + $0x8] sm:$0xff] }
 0x2a2   : > { %v1034_v45 = vpop.f32.mrb[4].mxu0  ;;  %v1104_v46 = vpop.f32.mrb[4].mxu1 }
 0x2a3   : > { %v2221_v47 = vpop.f32.mrb[5].mxu0  ;;  %v2226_v48 = vpop.f32.mrb[5].mxu1  ;;  %v1119_v50 = vsel %vm1112_vm2, %v1034_v45, -inf  ;;  %v1122_v51 = vsel %vm1112_vm2, %v1104_v46, -inf }
 0x2a4   : > { %1117 = vmax.xlane.f32.xlu0 %v1116_v49  ;;  %1120 = vmax.xlane.f32.xlu1 %v1119_v50  ;;  %v1176_v50 = vld [vmem:[#allocation4 + $0x18] sm:$0xff] }
 0x2a8   : > { %1123 = vmax.xlane.f32.xlu1 %v1122_v51 }
 0x32d   : > { %v1115_v54 = vpop.xlane.xlu0 %1114 }
 0x32e   : > { %v3148_v55 = vmax.f32 %v3145_v53, %v1115_v54 }
 0x330   : > { %v1129_v59 = vsub.f32 %v3145_v53, %v3148_v55  ;;  %1530 = vst.msk [vmem:[#allocation3] sm:$0xff] %vm803_vm1, %v3148_v55  ;;  %1143 = vperm.xlu0 %2478, %v3148_v55  }
 0x331   : > { %v1118_v60 = vpop.xlane.xlu0 %1117  ;;  %v1121_v61 = vpop.xlane.xlu1 %1120 }
 0x332   : > { %v1126_v62 = vmax.f32 %v1109_v56, %v1118_v60  ;;  %v1127_v63 = vmax.f32 %v3150_v58, %v1121_v61  ;;  %v1133_v33 = vmul.f32 1.442695, %v1129_v59  ;;  %v1725_v60 = vld [vmem:[#allocation14 + $0x80] sm:$0xff]  ;;  %v1726_v61 = vld [vmem:[#allocation14 + $0x88] sm:$0xff] }
 0x334   : > { %v1130_v2 = vsub.f32 %v1109_v56, %v1126_v62  ;;  %1531 = vst.msk [vmem:[#allocation3 + $0x8] sm:$0xff] %vm803_vm1, %v1126_v62  ;;  %v1131_v3 = vsub.f32 %v3150_v58, %v1127_v63  ;;  %1532 = vst.msk [vmem:[#allocation3 + $0x10] sm:$0xff] %vm803_vm1, %v1127_v63  ;;  %1148 = vperm.xlu1 %2479, %v1126_v62   ;;  %v1757_v62 = vld [vmem:[#allocation14 + $0x180] sm:$0xff] }
 0x335   : > { %v1124_v4 = vpop.xlane.xlu1 %1123 }
 0x336   : > { %v1128_v5 = vmax.f32 %v1111_v1, %v1124_v4  ;;  %v1135_v31 = vmul.f32 1.442695, %v1130_v2  ;;  %v1758_v2 = vld [vmem:[#allocation14 + $0x188] sm:$0xff] }
 0x337   : > { %v2343_v4 = vpack.c.bf16 %v1758_v2, %v1757_v62  ;;  %v1735_v62 = vld [vmem:[#allocation14 + $0xd0] sm:$0xff] }
 0x338   : > { %v1132_v7 = vsub.f32 %v1111_v1, %v1128_v5  ;;  %1533 = vst.msk [vmem:[#allocation3 + $0x18] sm:$0xff] %vm803_vm1, %v1128_v5  ;;  %1153 = vperm.xlu1 %2479, %v1127_v63   ;;  %v2311_v1 = vpack.c.bf16 %v1726_v61, %v1725_v60  ;;  %v1750_v60 = vld [vmem:[#allocation14 + $0x148] sm:$0xff] }
 0x33a   : > { %v1139_v34 = vmul.f32 1.442695, %v1132_v7  ;;  %v1741_v7 = vld [vmem:[#allocation14 + $0x100] sm:$0xff] }
 0x33c   : > { %1158 = vperm.xlu1 %2479, %v1128_v5   ;;  %v1710_v5 = vld [vmem:[#allocation14 + $0x8] sm:$0xff] }
 0x3af   : > { %v1144_v10 = vpop.permute.xlu0 %1143 }
 0x3b0   : > { %v1161_v11 = vsub.f32 %v894_v40, %v1144_v10  ;;  %v2345_v10 = vpack.c.bf16 %v1742_v8, %v1741_v7 }
 0x3b2   : > { %v1165_v12 = vmul.f32 1.442695, %v1161_v11 }
 0x3b3   : > { %v1149_v13 = vpop.permute.xlu1 %1148 }
 0x3b4   : > { %2480 = vpow2.f32 %v1165_v12  ;;  %v1162_v14 = vsub.f32 %v964_v41, %v1149_v13  ;;  %v1727_v12 = vld [vmem:[#allocation14 + $0x90] sm:$0xff]  ;;  %v1728_v13 = vld [vmem:[#allocation14 + $0x98] sm:$0xff] }
 0x3b6   : > { %v1167_v15 = vmul.f32 1.442695, %v1162_v14  ;;  %v1759_v14 = vld [vmem:[#allocation14 + $0x190] sm:$0xff] }
 0x3b7   : > { %v1154_v16 = vpop.permute.xlu1 %1153 }
 0x3b8   : > { %2482 = vpow2.f32 %v1167_v15  ;;  %v1163_v17 = vsub.f32 %v1034_v45, %v1154_v16  ;;  %v2315_v15 = vpack.c.bf16 %v1728_v13, %v1727_v12  ;;  %v1760_v16 = vld [vmem:[#allocation14 + $0x198] sm:$0xff]  ;;  %v1737_v12 = vld [vmem:[#allocation14 + $0xe0] sm:$0xff]  ;;  %v1738_v13 = vld [vmem:[#allocation14 + $0xe8] sm:$0xff] }
 0x3ba   : > { %v1169_v18 = vmul.f32 1.442695, %v1163_v17  ;;  %v1711_v17 = vld [vmem:[#allocation14 + $0x10] sm:$0xff] }
 0x3bb   : > { %v1159_v19 = vpop.permute.xlu1 %1158 }
 0x3bc   : > { %2484 = vpow2.f32 %v1169_v18  ;;  %v1164_v20 = vsub.f32 %v1104_v46, %v1159_v19  ;;  %v1175_v46 = vld [vmem:[#allocation4 + $0x10] sm:$0xff]  ;;  %v1712_v18 = vld [vmem:[#allocation14 + $0x18] sm:$0xff]  ;;  %v2347_v19 = vpack.c.bf16 %v1760_v16, %v1759_v14  ;;  %v1770_v16 = vld [vmem:[#allocation14 + $0x1e8] sm:$0xff] }
 0x3bd   : > { %v1769_v14 = vld [vmem:[#allocation14 + $0x1e0] sm:$0xff] }
 0x3be   : > { %v2481_v22 = vpop.eup %2480  ;;  %v1171_v23 = vmul.f32 1.442695, %v1164_v20  ;;  %v2317_v20 = vpack.c.bf16 %v1712_v18, %v1711_v17  ;;  %v1721_v17 = vld [vmem:[#allocation14 + $0x60] sm:$0xff]  ;;  %v1722_v18 = vld [vmem:[#allocation14 + $0x68] sm:$0xff] }
 0x3bf   : > { %2230 = vmatmul.mubr.msk.f32.vlgmr.msra.gmra.mrb[6].mxu0 %vm1112_vm2, %v2481_v22  ;;  %v1181_v24 = vsel %vm1112_vm2, %v2481_v22, 0.0  ;;  %v1744_v22 = vld [vmem:[#allocation14 + $0x118] sm:$0xff] }
 0x3c0   : > { %2486 = vpow2.f32 %v1171_v23  ;;  %1182 = vadd.xlane.f32.xlu1 %v1181_v24  ;;  %2238 = vmatpush3.msra.mxu0 %v822_v21  ;;  %v1743_v21 = vld [vmem:[#allocation14 + $0x110] sm:$0xff] }
 0x3c1   : > { %2239 = vmatprep.mubr.msk.f32.mxu0 %vm2752_vm0, %v2751_v0  ;;  %2488 = vpow2.f32 %v1135_v31  ;;  %2312 = vmatprep.subr.bf16.mxu0 %v2311_v1  ;;  %v2349_v23 = vpack.c.bf16 %v1744_v22, %v1743_v21  ;;  %v1714_v31 = vld [vmem:[#allocation14 + $0x28] sm:$0xff]  ;;  %v1767_v1 = vld [vmem:[#allocation14 + $0x1d0] sm:$0xff]  ;;  %v1753_v21 = vld [vmem:[#allocation14 + $0x160] sm:$0xff] }
 0x3c2   : > { %v2483_v26 = vpop.eup %2482  ;;  %2490 = vpow2.f32 %v1133_v33  ;;  %v1754_v22 = vld [vmem:[#allocation14 + $0x168] sm:$0xff] }
 0x3c3   : > { %2235 = vmatmul.mubr.msk.f32.vlgmr.msra.gmra.mrb[6].mxu1 %vm1112_vm2, %v2483_v26  ;;  %v1184_v27 = vsel %vm1112_vm2, %v2483_v26, 0.0  ;;  %v1730_v26 = vld [vmem:[#allocation14 + $0xa8] sm:$0xff] }
 0x3c4   : > { %1185 = vadd.xlane.f32.xlu0 %v1184_v27  ;;  %2243 = vmatpush3.msra.mxu1 %v823_v25  ;;  %v1729_v25 = vld [vmem:[#allocation14 + $0xa0] sm:$0xff] }
 0x3c5   : > { %2244 = vmatprep.mubr.msk.f32.mxu1 %vm2752_vm0, %v2751_v0  ;;  %v1137_v0 = vmul.f32 1.442695, %v1131_v3  ;;  %v1709_v3 = vld [vmem:[#allocation14] sm:$0xff]  ;;  %2344 = vmatprep.subr.bf16.mxu1 %v2343_v4  ;;  %v1719_v4 = vld [vmem:[#allocation14 + $0x50] sm:$0xff] }
 0x3c6   : > { %v2485_v28 = vpop.eup %2484  ;;  %v2313_v9 = vpack.c.bf16 %v1710_v5, %v1709_v3  ;;  %v1761_v27 = vld [vmem:[#allocation14 + $0x1a0] sm:$0xff]  ;;  %v1768_v3 = vld [vmem:[#allocation14 + $0x1d8] sm:$0xff] }
 0x3c7   : > { %2240 = vmatmul.mubr.msk.f32.vlgmr.msra.gmra.mrb[8].mxu0 %vm1112_vm2, %v2485_v28  ;;  %v1187_v29 = vsel %vm1112_vm2, %v2485_v28, 0.0  ;;  %2492 = vpow2.f32 %v1137_v0  ;;  %v2319_v28 = vpack.c.bf16 %v1730_v26, %v1729_v25  ;;  %v1745_v0 = vld [vmem:[#allocation14 + $0x120] sm:$0xff]  ;;  %v1720_v5 = vld [vmem:[#allocation14 + $0x58] sm:$0xff]  ;;  %v2363_v7 = vpack.c.bf16 %v1768_v3, %v1767_v1  ;;  %v1771_v26 = vld [vmem:[#allocation14 + $0x1f0] sm:$0xff] }
 0x3c8   : > { %1188 = vadd.xlane.f32.xlu1 %v1187_v29  ;;  %2494 = vpow2.f32 %v1139_v34  ;;  %2314 = vmatpush3.bf16.msra.mxu0 %v2313_v9  ;;  %v1762_v29 = vld [vmem:[#allocation14 + $0x1a8] sm:$0xff]  ;;  %v2333_v8 = vpack.c.bf16 %v1720_v5, %v1719_v4  ;;  %v1751_v9 = vld [vmem:[#allocation14 + $0x150] sm:$0xff]  ;;  %v1740_v25 = vld [vmem:[#allocation14 + $0xf8] sm:$0xff] }
 0x3c9   : > { %2316 = vmatprep.subr.bf16.mxu0 %v2315_v15  ;;  %v1746_v34 = vld [vmem:[#allocation14 + $0x128] sm:$0xff]  ;;  %v2335_v15 = vpack.c.bf16 %v1738_v13, %v1737_v12 }
 0x3ca   : > { %v2487_v30 = vpop.eup %2486 }
 0x3cb   : > { %2245 = vmatmul.mubr.msk.f32.vlgmr.msra.gmra.mrb[8].mxu1 %vm1112_vm2, %v2487_v30  ;;  %v1190_v32 = vsel %vm1112_vm2, %v2487_v30, 0.0  ;;  %v2489_v35 = vpop.eup %2488  ;;  %v1713_v30 = vld [vmem:[#allocation14 + $0x20] sm:$0xff] }
 0x3cc   : > { %1191 = vadd.xlane.f32.xlu1 %v1190_v32  ;;  %v2491_v36 = vpop.eup %2490  ;;  %v1178_v44 = vmul.f32 %v2489_v35, %v1174_v42  ;;  %2346 = vmatpush3.bf16.msra.mxu1 %v2345_v10  ;;  %v2351_v32 = vpack.c.bf16 %v1762_v29, %v1761_v27  ;;  %v2321_v33 = vpack.c.bf16 %v1714_v31, %v1713_v30  ;;  %v1715_v42 = vld [vmem:[#allocation14 + $0x30] sm:$0xff]  ;;  %v1752_v10 = vld [vmem:[#allocation14 + $0x158] sm:$0xff] }
 0x3cd   : > { %v1177_v40 = vmul.f32 %v2491_v36, %v1173_v39  ;;  %2348 = vmatprep.subr.bf16.mxu1 %v2347_v19  ;;  %2318 = vmatpush3.bf16.msra.mxu0 %v2317_v20  ;;  %v1763_v39 = vld [vmem:[#allocation14 + $0x1b0] sm:$0xff]  ;;  %v2367_v19 = vpack.c.bf16 %v1770_v16, %v1769_v14  ;;  %v2337_v20 = vpack.c.bf16 %v1722_v18, %v1721_v17  ;;  %v1772_v27 = vld [vmem:[#allocation14 + $0x1f8] sm:$0xff] }
 0x3ce   : > { %2320 = vmatprep.subr.bf16.mxu0 %v2319_v28  ;;  %v2371_v29 = vpack.c.bf16 %v1772_v27, %v1771_v26  ;;  %v1723_v30 = vld [vmem:[#allocation14 + $0x70] sm:$0xff]  ;;  %v1724_v31 = vld [vmem:[#allocation14 + $0x78] sm:$0xff] }
 0x3d0   : > { %2350 = vmatpush3.bf16.msra.mxu1 %v2349_v23  ;;  %v1739_v23 = vld [vmem:[#allocation14 + $0xf0] sm:$0xff] }
 0x3d1   : > { %v2493_v37 = vpop.eup %2492  ;;  %2352 = vmatprep.subr.bf16.mxu1 %v2351_v32  ;;  %2322 = vmatpush3.bf16.msra.mxu0 %v2321_v33  ;;  %v2339_v28 = vpack.c.bf16 %v1740_v25, %v1739_v23  ;;  %v1755_v32 = vld [vmem:[#allocation14 + $0x170] sm:$0xff]  ;;  %v1756_v33 = vld [vmem:[#allocation14 + $0x178] sm:$0xff] }
 0x3d2   : > { %v2495_v38 = vpop.eup %2494  ;;  %v1179_v48 = vmul.f32 %v2493_v37, %v1175_v46  ;;  %v1747_v46 = vld [vmem:[#allocation14 + $0x130] sm:$0xff] }
 0x3d3   : > { %v1180_v53 = vmul.f32 %v2495_v38, %v1176_v50  ;;  %v1734_v50 = vld [vmem:[#allocation14 + $0xc8] sm:$0xff] }
 0x3da   : > { %1213 = vperm.xlu0 %2478, %v2489_v35   ;;  %v2353_v35 = vpack.c.bf16 %v1746_v34, %v1745_v0  ;;  %v2341_v0 = vpack.c.bf16 %v1724_v31, %v1723_v30  ;;  %v2373_v34 = vpack.c.bf16 %v1756_v33, %v1755_v32 }
 0x3dc   : > { %2354 = vmatpush3.bf16.msra.mxu1 %v2353_v35 }
 0x3dd   : > { %1208 = vperm.xlu1 %2479, %v2491_v36  }
 0x3e1   : > { %1218 = vperm.xlu1 %2479, %v2493_v37   ;;  %v1731_v37 = vld [vmem:[#allocation14 + $0xb0] sm:$0xff] }
 0x3e5   : > { %1223 = vperm.xlu1 %2479, %v2495_v38   ;;  %v1732_v38 = vld [vmem:[#allocation14 + $0xb8] sm:$0xff] }
 0x44d   : > { %v1183_v41 = vpop.xlane.xlu1 %1182 }
 0x44e   : > { %v1193_v43 = vadd.f32 %v1183_v41, %v1177_v40  ;;  %v2323_v40 = vpack.c.bf16 %v1732_v38, %v1731_v37  ;;  %v1764_v41 = vld [vmem:[#allocation14 + $0x1b8] sm:$0xff] }
 0x450   : > { %1198 = vst.msk [vmem:[#allocation4] sm:$0xff] %vm803_vm1, %v1193_v43  ;;  %v1716_v43 = vld [vmem:[#allocation14 + $0x38] sm:$0xff]  ;;  %2324 = vmatprep.subr.bf16.mxu0 %v2323_v40 }
 0x451   : > { %v1186_v45 = vpop.xlane.xlu0 %1185 }
 0x452   : > { %v1194_v47 = vadd.f32 %v1186_v45, %v1178_v44  ;;  %v2355_v44 = vpack.c.bf16 %v1764_v41, %v1763_v39  ;;  %v2325_v45 = vpack.c.bf16 %v1716_v43, %v1715_v42 }
 0x454   : > { %1199 = vst.msk [vmem:[#allocation4 + $0x8] sm:$0xff] %vm803_vm1, %v1194_v47  ;;  %v1748_v47 = vld [vmem:[#allocation14 + $0x138] sm:$0xff]  ;;  %2356 = vmatprep.subr.bf16.mxu1 %v2355_v44  ;;  %2326 = vmatpush3.bf16.msra.mxu0 %v2325_v45 }
 0x455   : > { %v1189_v49 = vpop.xlane.xlu1 %1188 }
 0x456   : > { %v1195_v51 = vadd.f32 %v1189_v49, %v1179_v48  ;;  %v2357_v48 = vpack.c.bf16 %v1748_v47, %v1747_v46  ;;  %v1733_v49 = vld [vmem:[#allocation14 + $0xc0] sm:$0xff] }
 0x457   : > { %v1537_v52 = vld [vmem:[#allocation4] sm:$0xff] }
 0x458   : > { %1200 = vst.msk [vmem:[#allocation4 + $0x10] sm:$0xff] %vm803_vm1, %v1195_v51  ;;  %2496 = vrcp.f32 %v1537_v52  ;;  %v1765_v51 = vld [vmem:[#allocation14 + $0x1c0] sm:$0xff]  ;;  %v2327_v52 = vpack.c.bf16 %v1734_v50, %v1733_v49  ;;  %2358 = vmatpush3.bf16.msra.mxu1 %v2357_v48 }
 0x459   : > { %v1192_v54 = vpop.xlane.xlu1 %1191  ;;  %v1214_v46 = vpop.permute.xlu0 %1213 }
 0x45a   : > { %v1196_v55 = vadd.f32 %v1192_v54, %v1180_v53  ;;  %v1766_v53 = vld [vmem:[#allocation14 + $0x1c8] sm:$0xff]  ;;  %v1717_v54 = vld [vmem:[#allocation14 + $0x40] sm:$0xff]  ;;  %2328 = vmatprep.subr.bf16.mxu0 %v2327_v52 }
 0x45b   : > { %v1538_v56 = vld [vmem:[#allocation4 + $0x8] sm:$0xff] }
 0x45c   : > { %1201 = vst.msk [vmem:[#allocation4 + $0x18] sm:$0xff] %vm803_vm1, %v1196_v55  ;;  %2498 = vrcp.f32 %v1538_v56  ;;  %v1718_v55 = vld [vmem:[#allocation14 + $0x48] sm:$0xff]  ;;  %v2359_v56 = vpack.c.bf16 %v1766_v53, %v1765_v51 }
 0x45d   : > { %v1209_v43 = vpop.permute.xlu1 %1208 }
 0x45e   : > { %2360 = vmatprep.subr.bf16.mxu1 %v2359_v56  ;;  %v1226_v48 = vmul.f32 0.0, %v1209_v43 }
 0x45f   : > { %v1539_v58 = vld [vmem:[#allocation4 + $0x10] sm:$0xff] }
 0x460   : > { %2500 = vrcp.f32 %v1539_v58  ;;  %v2329_v58 = vpack.c.bf16 %v1718_v55, %v1717_v54  ;;  %v1227_v54 = vmul.f32 0.0, %v1214_v46 }
 0x461   : > { %v1219_v44 = vpop.permute.xlu1 %1218 }
 0x462   : > { %v2497_v59 = vpop.eup %2496  ;;  %2330 = vmatpush3.bf16.msra.mxu0 %v2329_v58  ;;  %v1228_v49 = vmul.f32 0.0, %v1219_v44 }
 0x463   : > { %1551 = vperm.xlu1 %2479, %v2497_v59   ;;  %v1540_v63 = vld [vmem:[#allocation4 + $0x18] sm:$0xff]  ;;  %v1749_v59 = vld [vmem:[#allocation14 + $0x140] sm:$0xff] }
 0x464   : > { %2502 = vrcp.f32 %v1540_v63  ;;  %v2361_v61 = vpack.c.bf16 %v1750_v60, %v1749_v59  ;;  %v1736_v63 = vld [vmem:[#allocation14 + $0xd8] sm:$0xff] }
 0x465   : > { %v2331_v2 = vpack.c.bf16 %v1736_v63, %v1735_v62  ;;  %v1224_v45 = vpop.permute.xlu1 %1223 }
 0x466   : > { %v2499_v11 = vpop.eup %2498  ;;  %2362 = vmatpush3.bf16.msra.mxu1 %v2361_v61  ;;  %v1229_v55 = vmul.f32 0.0, %v1224_v45 }
 0x467   : > { %1556 = vperm.xlu0 %2478, %v2499_v11   ;;  %2332 = vmatprep.subr.bf16.mxu0 %v2331_v2  ;;  %v2365_v11 = vpack.c.bf16 %v1752_v10, %v1751_v9 }
 0x468   : > { %2364 = vmatprep.subr.bf16.mxu1 %v2363_v7  ;;  %2334 = vmatpush3.bf16.msra.mxu0 %v2333_v8 }
 0x469   : > { %2336 = vmatprep.subr.bf16.mxu0 %v2335_v15 }
 0x46a   : > { %v2501_v24 = vpop.eup %2500  ;;  %2366 = vmatpush3.bf16.msra.mxu1 %v2365_v11 }
 0x46b   : > { %1561 = vperm.xlu1 %2479, %v2501_v24   ;;  %v2369_v24 = vpack.c.bf16 %v1754_v22, %v1753_v21  ;;  %2368 = vmatprep.subr.bf16.mxu1 %v2367_v19 }
 0x46c   : > { %2338 = vmatpush3.bf16.msra.mxu0 %v2337_v20 }
 0x46d   : > { %2340 = vmatprep.subr.bf16.mxu0 %v2339_v28 }
 0x46e   : > { %v2503_v36 = vpop.eup %2502  ;;  %2370 = vmatpush3.bf16.msra.mxu1 %v2369_v24 }
 0x46f   : > { %1566 = vperm.xlu0 %2478, %v2503_v36   ;;  %2372 = vmatprep.subr.bf16.mxu1 %v2371_v29 }
 0x470   : > { %2342 = vmatpush3.bf16.msra.mxu0 %v2341_v0 }
 0x472   : > { %2374 = vmatpush3.bf16.msra.mxu1 %v2373_v34 }
 0x492   : > { %v1299_v35 = vpop.f32.mrb[6].mxu0 }
 0x493   : > { %v2231_v36 = vpop.f32.mrb[7].mxu0  ;;  %v1522_v50 = vadd.f32 %v1299_v35, %v1226_v48 }
 0x496   : > { %v1372_v37 = vpop.f32.mrb[6].mxu1 }
 0x497   : > { %v2236_v38 = vpop.f32.mrb[7].mxu1  ;;  %v1523_v59 = vadd.f32 %v1372_v37, %v1227_v54 }
 0x498   : > { %v2114_v38 = vld [vmem:[%s3331_s26] ss:$0 sm:$0xff] }
 0x49a   : > { %v1445_v39 = vpop.f32.mrb[8].mxu0 }
 0x49b   : > { %v2241_v40 = vpop.f32.mrb[9].mxu0  ;;  %v1524_v51 = vadd.f32 %v1445_v39, %v1228_v49 }
 0x49e   : > { %v1518_v41 = vpop.f32.mrb[8].mxu1 }
 0x49f   : > { %v2246_v42 = vpop.f32.mrb[9].mxu1  ;;  %v1525_v60 = vadd.f32 %v1518_v41, %v1229_v55 }
 0x4e2   : > { %v1552_v47 = vpop.permute.xlu1 %1551 }
 0x4e3   : > { %v1569_v56 = vmul.f32 %v1552_v47, %v1522_v50 }
 0x4e6   : > { %v1557_v52 = vpop.permute.xlu0 %1556 }
 0x4e7   : > { %v1570_v1 = vmul.f32 %v1557_v52, %v1523_v59 }
 0x4ea   : > { %v1562_v53 = vpop.permute.xlu1 %1561 }
 0x4eb   : > { %v1571_v58 = vmul.f32 %v1562_v53, %v1524_v51 }
 0x4ed   : > { %v1573_v61 = vcombine.low %v1569_v56, %v1571_v58  ;;  %v1574_v62 = vcombine.high %v1569_v56, %v1571_v58 }
 0x4ee   : > { %v1567_v63 = vpop.permute.xlu0 %1566 }
 0x4ef   : > { %v1572_v2 = vmul.f32 %v1567_v63, %v1525_v60  ;;  %v1581_v5 = vrot.slane %v1573_v61, %v3097_v57  ;;  %v1588_v7 = vrot.slane %v1574_v62, %v3097_v57 }
 0x4f1   : > { %v1589_v3 = vcombine.low %v1570_v1, %v1572_v2  ;;  %v1590_v4 = vcombine.high %v1570_v1, %v1572_v2 }
 0x4f3   : > { %v1597_v8 = vrot.slane %v1589_v3, %v3097_v57  ;;  %v1604_v9 = vrot.slane %v1590_v4, %v3097_v57 }
 0x4f5   : > { %v1605_v10 = vcombine.low %v1581_v5, %v1597_v8  ;;  %v1606_v11 = vcombine.high %v1581_v5, %v1597_v8  ;;  %v1621_v12 = vcombine.low %v1588_v7, %v1604_v9  ;;  %v1622_v13 = vcombine.high %v1588_v7, %v1604_v9 }
 0x4f7   : > { %v1613_v14 = vrot.slane %v1605_v10, %v3101_v6  ;;  %v1620_v15 = vrot.slane %v1606_v11, %v3101_v6  ;;  %v1629_v16 = vrot.slane %v1621_v12, %v3101_v6  ;;  %v1636_v17 = vrot.slane %v1622_v13, %v3101_v6 }
 0x4f9   : > { %v1641_v18 = vcombine.low %v1613_v14, %v1620_v15  ;;  %v2112_v19 = vcombine.high %v1613_v14, %v1620_v15  ;;  %v1657_v20 = vcombine.low %v1629_v16, %v1636_v17  ;;  %v2113_v21 = vcombine.high %v1629_v16, %v1636_v17 }
 0x4fb   : > { %v1648_v22 = vrot.slane %v1641_v18, %v3097_v57  ;;  %v1656_v23 = vrot.slane %v2112_v19, %v3097_v57  ;;  %v1664_v24 = vrot.slane %v1657_v20, %v3097_v57  ;;  %v1672_v25 = vrot.slane %v2113_v21, %v3097_v57 }
 0x4fd   : > { %v1673_v26 = vcombine.low %v1648_v22, %v1656_v23  ;;  %v1689_v27 = vcombine.low %v1664_v24, %v1672_v25  ;;  %v1674_v28 = vcombine.high %v1648_v22, %v1656_v23  ;;  %v1690_v29 = vcombine.high %v1664_v24, %v1672_v25 }
 0x4ff   : > { %v1681_v30 = vrot.slane %v1673_v26, %v3101_v6  ;;  %v1697_v31 = vrot.slane %v1689_v27, %v3101_v6  ;;  %v1688_v32 = vrot.slane %v1674_v28, %v3101_v6  ;;  %v1704_v33 = vrot.slane %v1690_v29, %v3101_v6 }
 0x501   : > { %v1706_v0 = vcombine.high %v1681_v30, %v1697_v31  ;;  %v1708_v34 = vcombine.high %v1688_v32, %v1704_v33  ;;  %v1705_v35 = vcombine.low %v1681_v30, %v1697_v31  ;;  %v1707_v36 = vcombine.low %v1688_v32, %v1704_v33 }
 0x503   : > { %1844 = vmatprep.mubr.f32.mxu0 %v1706_v0  ;;  %1914 = vmatprep.mubr.f32.mxu1 %v1708_v34 }
 0x504   : > { %1845 = vmatmul.mubr.f32.vlgmr.msra.gmra.mrb[10].mxu0 %v1705_v35  ;;  %1915 = vmatmul.mubr.f32.vlgmr.msra.gmra.mrb[10].mxu1 %v1707_v36 }
 0x5d7   : > { %v2169_v57 = vpop.f32.mrb[10].mxu0  ;;  %v2204_v37 = vpop.f32.mrb[10].mxu1 }
 0x5d8   : > { %v2170_v39 = vpop.f32.mrb[11].mxu0  ;;  %v2205_v6 = vpop.f32.mrb[11].mxu1 }
 0x5d9   : > { %v2171_v40 = vadd.f32 %v2170_v39, %v2169_v57  ;;  %v2206_v41 = vadd.f32 %v2205_v6, %v2204_v37 }
 0x5db   : > { %v1847_v42 = vadd.f32 %v2171_v40, %v2114_v38 }
 0x5dd   : > { %v1917_v43 = vadd.f32 %v2206_v41, %v1847_v42 }
 0x5df   : > { %1920 = vst [vmem:[%s429_s17] sm:$0xff] %v1917_v43 }
 0x5e0   : > { %2663 = shalt.err (!%p2660_p5)
}
 0x5e1   : > { %s2664_s16 = scalar_lea.hbm %s3212_s3, 128  ;;  %s2668_s10 = scalar_lea.hbm %s3333_s9, 256 }
 0x5e2   : > { %p2665_p8 = scmp.ne.s32.totalorder %s3212_s3, %s2664_s16  ;;  %p2669_p7 = scmp.lt.u32.totalorder %s3212_s3, %s3333_s9 }
 0x5e3   : > { %p2670_p13 = scmp.lt.u32.totalorder %s2668_s10, %s2664_s16  ;;  %p2672_p10 = scmp.lt.u32.totalorder %s2664_s16, %s3212_s3 }
 0x5e4   : > { %p2666_p12 = pnand %p2665_p8, %p3334_p11 }
 0x5e5   : > { %p2671_p2 = por %p2670_p13, %p2669_p7 }
 0x5e6   : > { %p2667_p0 = pneg %p2666_p12 }
 0x5e7   : > { %p2673_p1 = por %p2672_p10, %p2671_p2 }
 0x5e9   : > { %p2674_p9 = pnand %p2673_p1, %p2667_p0 }
 0x5eb   : > { %2677 = shalt.err (!%p2674_p9)
}
 0x5ec   : > { %2389 = dma.vmem_to_hbm [thread:$0]  (%p3334_p11), %s3214_s21, 128, %s3212_s3, %s1922_s8  }
 0x5ed PF: > { %s3335_s30 = sld [smem:[#allocation20_spill]]  ;;  %s3336_s11 = sld [smem:[#allocation25_spill]] }
 0x5ee   : > { %s3337_s24 = sld [smem:[#allocation23_spill]] }
 0x5f3   : > { %s1948_s13 = sand.u32 1, %s3335_s30   ;;  %p3338_p6 = scmp.ne.s32.totalorder %s3336_s11, 0 }
 0x5f4   : > { %p3339_p3 = scmp.ge.s32.totalorder %s3337_s24, 2  ;;  %s1949_s6 = scalar_lea.sflag [#allocation8], %s1948_s13 }
 0x5f6   : > { %p2409_p4 = pnand %p3339_p3, %p3338_p6 }
 0x5f8   : > { %2715 = dma.done.wait (!%p2409_p4), %s1949_s6, 128  }
 0x5f9   : > { %2717 = vsyncadd (!%p2409_p4), %s1949_s6, 4294967168  ;;  %s27_s29 = sadd.s32 1, %s3337_s24   ;;  %s3340_s7 = sld [smem:[#allocation21_spill]] }
 0x5fa   : > { %p24_p5 = scmp.ge.s32.totalorder %s27_s29, 4   ;;  %s3341_s26 = sld [smem:[#allocation27_spill]] }
 0x5fb   : > { %s3342_s12 = sld [smem:[#allocation26_spill]]  ;;  %s3343_s24 = smov %s2724_s25 }
 0x5fc   : > { %s3345_s27 = smov %s2736_s28  ;;  %26 = sbr.rel (!%p24_p5) target bundleno = 15 (0xf), region = 133 }
 0x5ff   : > { %s3344_s25 = smov %s3340_s7 }
 0x601   : > { %s3346_s28 = smov %s3342_s12 }
 0x603   :  { %1954 = vsyncpa [#allocation7], 1 }
 0x604   :  { %1956 = vsyncpa [#allocation7 + $0x1], 1 }
 0x605   :  { %1957 = vsyncpa [#allocation10], 1 }
 0x606   :  { %1959 = vsyncpa [#allocation10 + $0x1], 1 }
 0x607   :  { %1960 = vsyncpa [#allocation13], 1 }
 0x608   :  { %1961 = vsyncpa [#allocation8], 1 }
 0x609   :  { %1963 = vsyncpa [#allocation8 + $0x1], 1 }

</bundles_post_ra>
